<compile_context>
chip_gen: v6e
topology: v6e:2x2x1
jax: 0.10.0
libtpu: 0.0.40
codegen_flags: <defaults>
</compile_context>

<pallas_src>
import jax
import jax.numpy as jnp
from jax import lax
from jax.experimental import pallas as pl
from jax.experimental.pallas import tpu as pltpu


# -----------------------------------------------------------------------------
# Pallas kernel: 2-layer LSTM recurrence over time + fc head.
# The layer-0 input projection (xw0 = x @ W_ih0 + b0) is precomputed and passed in.
# -----------------------------------------------------------------------------
def lstm_fc_kernel(xw0_ref,     # (T, B, 4H)  precomputed layer-0 input proj (+ bias)
                   whh0_ref,    # (H, 4H)     layer-0 recurrent weights (transposed)
                   w1_ref,      # (2H, 4H)    layer-1 [W_ih1; W_hh1] stacked (transposed)
                   b1_ref,      # (1, 4H)     layer-1 bias (b_ih + b_hh)
                   wfc_ref,     # (1, H)      fc weight row (output_dim == 1)
                   bfc_ref,     # (1, 1)      fc bias
                   out_ref):    # (B, 1)
    T, B, H4 = xw0_ref.shape
    H = whh0_ref.shape[0]

    whh0 = whh0_ref[...]
    w1 = w1_ref[...]

    # Hoisted: bias broadcast (JAX does not CSE broadcast_in_dim inside the loop).
    b1 = jnp.broadcast_to(b1_ref[...], (B, H4))

    # Hoisted: static lane mask selecting the tanh ("g") gate lanes [2H, 3H).
    lane = lax.broadcasted_iota(jnp.int32, (B, H4), 1)
    tanh_mask = (lane >= 2 * H) & (lane < 3 * H)

    def activate(g):
        # Full-width EUP pass + per-lane select instead of 4 sub-vreg sliced activations.
        return jnp.where(tanh_mask, jnp.tanh(g), jax.nn.sigmoid(g))

    def combine(act, c):
        i = act[:, 0:H]
        f = act[:, H:2 * H]
        gg = act[:, 2 * H:3 * H]
        o = act[:, 3 * H:4 * H]
        c_new = f * c + i * gg
        h_new = o * jnp.tanh(c_new)
        return h_new, c_new

    def step(t, carry):
        h1, c1, h2, c2 = carry
        # Layer 0: only the recurrent matmul stays on the serial chain.
        g0 = xw0_ref[t] + jnp.dot(h1, whh0, preferred_element_type=jnp.float32)
        h1, c1 = combine(activate(g0), c1)
        # Layer 1: one fused (B, 2H) @ (2H, 4H) matmul per step.
        hcat = jnp.concatenate([h1, h2], axis=-1)
        g1 = jnp.dot(hcat, w1, preferred_element_type=jnp.float32) + b1
        h2, c2 = combine(activate(g1), c2)
        return (h1, c1, h2, c2)

    z = jnp.zeros((B, H), jnp.float32)
    _, _, h2, _ = lax.fori_loop(0, T, step, (z, z, z, z), unroll=True)

    # fc head on hn[-1]; output_dim == 1 -> VPU multiply + lane reduce (no MXU pop).
    out_ref[...] = (jnp.sum(h2 * wfc_ref[...], axis=-1, keepdims=True)
                    + bfc_ref[...]).astype(out_ref.dtype)


# -----------------------------------------------------------------------------
# One-time parameter preparation (PyTorch layout -> kernel layout).
# -----------------------------------------------------------------------------
def prepare_params(params):
    """params use PyTorch shapes: w*: (4H, in), b*: (4H,), wfc: (O, H), bfc: (O,)."""
    H = params["whh0"].shape[1]
    O = params["wfc"].shape[0]
    assert O == 1, "fc head specialized for output_dim == 1"
    return {
        "wih0": params["wih0"].T,                                              # (D, 4H)
        "b0":   (params["bih0"] + params["bhh0"]).reshape(1, 4 * H),           # (1, 4H)
        "whh0": params["whh0"].T,                                              # (H, 4H)
        "w1":   jnp.concatenate([params["wih1"].T, params["whh1"].T], axis=0), # (2H, 4H)
        "b1":   (params["bih1"] + params["bhh1"]).reshape(1, 4 * H),           # (1, 4H)
        "wfc":  params["wfc"].reshape(1, H),                                   # (1, H)
        "bfc":  params["bfc"].reshape(1, 1),                                   # (1, 1)
    }


# -----------------------------------------------------------------------------
# Forward wrapper: time-major transpose + hoisted layer-0 input projection + pallas_call.
# -----------------------------------------------------------------------------
@jax.jit
def lstm_model_forward(x, prep):
    """x: (B, T, D) float32 (PyTorch batch_first). Returns (B, 1)."""
    B, T, D = x.shape
    H = prep["whh0"].shape[0]
    H4 = 4 * H

    x_tm = jnp.transpose(x, (1, 0, 2))                       # (T, B, D) time-major
    # Hoisted layer-0 input projection (+ bias): one big matmul, off the serial chain.
    xw0 = (x_tm.reshape(T * B, D) @ prep["wih0"] + prep["b0"]).reshape(T, B, H4)

    vmem = pl.BlockSpec(memory_space=pltpu.MemorySpace.VMEM)
    return pl.pallas_call(
        lstm_fc_kernel,
        out_shape=jax.ShapeDtypeStruct((B, 1), jnp.float32),
        in_specs=[vmem] * 6,
        out_specs=vmem,
    )(xw0, prep["whh0"], prep["w1"], prep["b1"], prep["wfc"], prep["bfc"])


# -----------------------------------------------------------------------------
# Pure-JAX reference (same math as PyTorch nn.LSTM + nn.Linear) for correctness.
# -----------------------------------------------------------------------------
def lstm_model_reference(x, params):
    B, T, D = x.shape
    H = params["whh0"].shape[1]

    def cell(x_t, h, c, wih, whh, bih, bhh):
        g = x_t @ wih.T + bih + h @ whh.T + bhh
        i = jax.nn.sigmoid(g[:, 0 * H:1 * H])
        f = jax.nn.sigmoid(g[:, 1 * H:2 * H])
        gg = jnp.tanh(g[:, 2 * H:3 * H])
        o = jax.nn.sigmoid(g[:, 3 * H:4 * H])
        c = f * c + i * gg
        h = o * jnp.tanh(c)
        return h, c

    h1 = c1 = h2 = c2 = jnp.zeros((B, H), jnp.float32)
    for t in range(T):
        x_t = x[:, t, :]
        h1, c1 = cell(x_t, h1, c1, params["wih0"], params["whh0"],
                      params["bih0"], params["bhh0"])
        h2, c2 = cell(h1, h2, c2, params["wih1"], params["whh1"],
                      params["bih1"], params["bhh1"])
    return h2 @ params["wfc"].T + params["bfc"]


def init_params(key, input_dim, hidden_dim, output_dim):
    """Deterministic init mimicking PyTorch's U(-1/sqrt(H), 1/sqrt(H))."""
    k = 1.0 / jnp.sqrt(jnp.float32(hidden_dim))
    names_shapes = [
        ("wih0", (4 * hidden_dim, input_dim)),
        ("whh0", (4 * hidden_dim, hidden_dim)),
        ("bih0", (4 * hidden_dim,)),
        ("bhh0", (4 * hidden_dim,)),
        ("wih1", (4 * hidden_dim, hidden_dim)),
        ("whh1", (4 * hidden_dim, hidden_dim)),
        ("bih1", (4 * hidden_dim,)),
        ("bhh1", (4 * hidden_dim,)),
        ("wfc", (output_dim, hidden_dim)),
        ("bfc", (output_dim,)),
    ]
    keys = jax.random.split(key, len(names_shapes))
    return {
        name: jax.random.uniform(kk, shape, jnp.float32, minval=-k, maxval=k)
        for kk, (name, shape) in zip(keys, names_shapes)
    }


if __name__ == "__main__":
    # Shapes consistent with the module: batch=2, seq=8, input_dim=8,
    # hidden_dim=64, num_layers=2, output_dim=1.
    B, T, D, H, O = 2, 8, 8, 64, 1

    root = jax.random.PRNGKey(0)
    kx, kp = jax.random.split(root)
    x = jax.random.normal(kx, (B, T, D), jnp.float32)
    params = init_params(kp, D, H, O)

    prep = prepare_params(params)          # one-time weight prep (not per call)
    out = lstm_model_forward(x, prep)
    out = jax.block_until_ready(out)

    ref = lstm_model_reference(x, params)
    assert out.shape == (B, O)
    assert jnp.allclose(out, ref, rtol=1e-3, atol=1e-3), (out, ref)

    print("KERNEL_OK")
</pallas_src>

<mosaic_0001>
module attributes {stable_mosaic.version = 11 : i64} {
  func.func @lstm_fc_kernel(%arg0: memref<8x2x256xf32, #tpu.memory_space<vmem>>, %arg1: memref<64x256xf32, #tpu.memory_space<vmem>>, %arg2: memref<128x256xf32, #tpu.memory_space<vmem>>, %arg3: memref<1x256xf32, #tpu.memory_space<vmem>>, %arg4: memref<1x64xf32, #tpu.memory_space<vmem>>, %arg5: memref<1x1xf32, #tpu.memory_space<vmem>>, %arg6: memref<2x1xf32, #tpu.memory_space<vmem>>) attributes {dimension_semantics = [], scalar_prefetch = 0 : i64, scratch_operands = 0 : i64, tpu.core_type = #tpu.core_type<tc>} {
    %c0 = arith.constant 0 : index
    %c0_0 = arith.constant 0 : index
    %0 = vector.load %arg1[%c0, %c0_0] : memref<64x256xf32, #tpu.memory_space<vmem>>, vector<64x256xf32>
    %c0_1 = arith.constant 0 : index
    %c0_2 = arith.constant 0 : index
    %1 = vector.load %arg2[%c0_1, %c0_2] : memref<128x256xf32, #tpu.memory_space<vmem>>, vector<128x256xf32>
    %c0_3 = arith.constant 0 : index
    %c0_4 = arith.constant 0 : index
    %2 = vector.load %arg3[%c0_3, %c0_4] : memref<1x256xf32, #tpu.memory_space<vmem>>, vector<1x256xf32>
    %3 = vector.shape_cast %2 : vector<1x256xf32> to vector<1x256xf32>
    %4 = vector.broadcast %3 : vector<1x256xf32> to vector<2x256xf32>
    %5 = tpu.iota {dimensions = array<i32: 1>} : vector<2x256xi32>
    %c128_i32 = arith.constant 128 : i32
    %6 = vector.broadcast %c128_i32 : i32 to vector<2x256xi32>
    %7 = arith.cmpi sge, %5, %6 : vector<2x256xi32>
    %c192_i32 = arith.constant 192 : i32
    %8 = vector.broadcast %c192_i32 : i32 to vector<2x256xi32>
    %9 = arith.cmpi slt, %5, %8 : vector<2x256xi32>
    %10 = arith.andi %7, %9 : vector<2x256xi1>
    %cst = arith.constant 0.000000e+00 : f32
    %11 = vector.broadcast %cst : f32 to vector<2x64xf32>
    %c0_i32 = arith.constant 0 : i32
    %12 = arith.index_cast %c0_i32 : i32 to index
    %c0_5 = arith.constant 0 : index
    %c0_6 = arith.constant 0 : index
    %13 = vector.load %arg0[%12, %c0_5, %c0_6] : memref<8x2x256xf32, #tpu.memory_space<vmem>>, vector<1x2x256xf32>
    %14 = vector.shape_cast %13 : vector<1x2x256xf32> to vector<2x256xf32>
    %cst_7 = arith.constant dense<0.000000e+00> : vector<2x256xf32>
    %15 = tpu.matmul %11, %0, %cst_7 {dimension_numbers = #tpu.dot_dimension_numbers<[1], [0], [0], [1], [0, 0, 1, 1], [], []>} : vector<2x64xf32>, vector<64x256xf32>, vector<2x256xf32> -> vector<2x256xf32>
    %16 = arith.addf %14, %15 : vector<2x256xf32>
    %17 = math.tanh %16 : vector<2x256xf32>
    %18 = arith.negf %16 : vector<2x256xf32>
    %19 = math.exp %18 : vector<2x256xf32>
    %cst_8 = arith.constant 1.000000e+00 : f32
    %20 = vector.broadcast %cst_8 : f32 to vector<2x256xf32>
    %21 = arith.addf %20, %19 : vector<2x256xf32>
    %22 = arith.divf %20, %21 : vector<2x256xf32>
    %23 = arith.select %10, %17, %22 : vector<2x256xi1>, vector<2x256xf32>
    %24 = vector.extract_strided_slice %23 {offsets = [0, 0], sizes = [2, 64], strides = [1, 1]} : vector<2x256xf32> to vector<2x64xf32>
    %25 = vector.extract_strided_slice %23 {offsets = [0, 64], sizes = [2, 64], strides = [1, 1]} : vector<2x256xf32> to vector<2x64xf32>
    %26 = vector.extract_strided_slice %23 {offsets = [0, 128], sizes = [2, 64], strides = [1, 1]} : vector<2x256xf32> to vector<2x64xf32>
    %27 = vector.extract_strided_slice %23 {offsets = [0, 192], sizes = [2, 64], strides = [1, 1]} : vector<2x256xf32> to vector<2x64xf32>
    %28 = arith.mulf %25, %11 : vector<2x64xf32>
    %29 = arith.mulf %24, %26 : vector<2x64xf32>
    %30 = arith.addf %28, %29 : vector<2x64xf32>
    %31 = math.tanh %30 : vector<2x64xf32>
    %32 = arith.mulf %27, %31 : vector<2x64xf32>
    %33 = tpu.concatenate %32, %11 in 1 : vector<2x64xf32>, vector<2x64xf32> -> vector<2x128xf32>
    %cst_9 = arith.constant dense<0.000000e+00> : vector<2x256xf32>
    %34 = tpu.matmul %33, %1, %cst_9 {dimension_numbers = #tpu.dot_dimension_numbers<[1], [0], [0], [1], [0, 0, 1, 1], [], []>} : vector<2x128xf32>, vector<128x256xf32>, vector<2x256xf32> -> vector<2x256xf32>
    %35 = arith.addf %34, %4 : vector<2x256xf32>
    %36 = math.tanh %35 : vector<2x256xf32>
    %37 = arith.negf %35 : vector<2x256xf32>
    %38 = math.exp %37 : vector<2x256xf32>
    %cst_10 = arith.constant 1.000000e+00 : f32
    %39 = vector.broadcast %cst_10 : f32 to vector<2x256xf32>
    %40 = arith.addf %39, %38 : vector<2x256xf32>
    %41 = arith.divf %39, %40 : vector<2x256xf32>
    %42 = arith.select %10, %36, %41 : vector<2x256xi1>, vector<2x256xf32>
    %43 = vector.extract_strided_slice %42 {offsets = [0, 0], sizes = [2, 64], strides = [1, 1]} : vector<2x256xf32> to vector<2x64xf32>
    %44 = vector.extract_strided_slice %42 {offsets = [0, 64], sizes = [2, 64], strides = [1, 1]} : vector<2x256xf32> to vector<2x64xf32>
    %45 = vector.extract_strided_slice %42 {offsets = [0, 128], sizes = [2, 64], strides = [1, 1]} : vector<2x256xf32> to vector<2x64xf32>
    %46 = vector.extract_strided_slice %42 {offsets = [0, 192], sizes = [2, 64], strides = [1, 1]} : vector<2x256xf32> to vector<2x64xf32>
    %47 = arith.mulf %44, %11 : vector<2x64xf32>
    %48 = arith.mulf %43, %45 : vector<2x64xf32>
    %49 = arith.addf %47, %48 : vector<2x64xf32>
    %50 = math.tanh %49 : vector<2x64xf32>
    %51 = arith.mulf %46, %50 : vector<2x64xf32>
    %c1_i32 = arith.constant 1 : i32
    %52 = arith.index_cast %c1_i32 : i32 to index
    %c0_11 = arith.constant 0 : index
    %c0_12 = arith.constant 0 : index
    %53 = vector.load %arg0[%52, %c0_11, %c0_12] : memref<8x2x256xf32, #tpu.memory_space<vmem>>, vector<1x2x256xf32>
    %54 = vector.shape_cast %53 : vector<1x2x256xf32> to vector<2x256xf32>
    %cst_13 = arith.constant dense<0.000000e+00> : vector<2x256xf32>
    %55 = tpu.matmul %32, %0, %cst_13 {dimension_numbers = #tpu.dot_dimension_numbers<[1], [0], [0], [1], [0, 0, 1, 1], [], []>} : vector<2x64xf32>, vector<64x256xf32>, vector<2x256xf32> -> vector<2x256xf32>
    %56 = arith.addf %54, %55 : vector<2x256xf32>
    %57 = math.tanh %56 : vector<2x256xf32>
    %58 = arith.negf %56 : vector<2x256xf32>
    %59 = math.exp %58 : vector<2x256xf32>
    %cst_14 = arith.constant 1.000000e+00 : f32
    %60 = vector.broadcast %cst_14 : f32 to vector<2x256xf32>
    %61 = arith.addf %60, %59 : vector<2x256xf32>
    %62 = arith.divf %60, %61 : vector<2x256xf32>
    %63 = arith.select %10, %57, %62 : vector<2x256xi1>, vector<2x256xf32>
    %64 = vector.extract_strided_slice %63 {offsets = [0, 0], sizes = [2, 64], strides = [1, 1]} : vector<2x256xf32> to vector<2x64xf32>
    %65 = vector.extract_strided_slice %63 {offsets = [0, 64], sizes = [2, 64], strides = [1, 1]} : vector<2x256xf32> to vector<2x64xf32>
    %66 = vector.extract_strided_slice %63 {offsets = [0, 128], sizes = [2, 64], strides = [1, 1]} : vector<2x256xf32> to vector<2x64xf32>
    %67 = vector.extract_strided_slice %63 {offsets = [0, 192], sizes = [2, 64], strides = [1, 1]} : vector<2x256xf32> to vector<2x64xf32>
    %68 = arith.mulf %65, %30 : vector<2x64xf32>
    %69 = arith.mulf %64, %66 : vector<2x64xf32>
    %70 = arith.addf %68, %69 : vector<2x64xf32>
    %71 = math.tanh %70 : vector<2x64xf32>
    %72 = arith.mulf %67, %71 : vector<2x64xf32>
    %73 = tpu.concatenate %72, %51 in 1 : vector<2x64xf32>, vector<2x64xf32> -> vector<2x128xf32>
    %cst_15 = arith.constant dense<0.000000e+00> : vector<2x256xf32>
    %74 = tpu.matmul %73, %1, %cst_15 {dimension_numbers = #tpu.dot_dimension_numbers<[1], [0], [0], [1], [0, 0, 1, 1], [], []>} : vector<2x128xf32>, vector<128x256xf32>, vector<2x256xf32> -> vector<2x256xf32>
    %75 = arith.addf %74, %4 : vector<2x256xf32>
    %76 = math.tanh %75 : vector<2x256xf32>
    %77 = arith.negf %75 : vector<2x256xf32>
    %78 = math.exp %77 : vector<2x256xf32>
    %cst_16 = arith.constant 1.000000e+00 : f32
    %79 = vector.broadcast %cst_16 : f32 to vector<2x256xf32>
    %80 = arith.addf %79, %78 : vector<2x256xf32>
    %81 = arith.divf %79, %80 : vector<2x256xf32>
    %82 = arith.select %10, %76, %81 : vector<2x256xi1>, vector<2x256xf32>
    %83 = vector.extract_strided_slice %82 {offsets = [0, 0], sizes = [2, 64], strides = [1, 1]} : vector<2x256xf32> to vector<2x64xf32>
    %84 = vector.extract_strided_slice %82 {offsets = [0, 64], sizes = [2, 64], strides = [1, 1]} : vector<2x256xf32> to vector<2x64xf32>
    %85 = vector.extract_strided_slice %82 {offsets = [0, 128], sizes = [2, 64], strides = [1, 1]} : vector<2x256xf32> to vector<2x64xf32>
    %86 = vector.extract_strided_slice %82 {offsets = [0, 192], sizes = [2, 64], strides = [1, 1]} : vector<2x256xf32> to vector<2x64xf32>
    %87 = arith.mulf %84, %49 : vector<2x64xf32>
    %88 = arith.mulf %83, %85 : vector<2x64xf32>
    %89 = arith.addf %87, %88 : vector<2x64xf32>
    %90 = math.tanh %89 : vector<2x64xf32>
    %91 = arith.mulf %86, %90 : vector<2x64xf32>
    %c2_i32 = arith.constant 2 : i32
    %92 = arith.index_cast %c2_i32 : i32 to index
    %c0_17 = arith.constant 0 : index
    %c0_18 = arith.constant 0 : index
    %93 = vector.load %arg0[%92, %c0_17, %c0_18] : memref<8x2x256xf32, #tpu.memory_space<vmem>>, vector<1x2x256xf32>
    %94 = vector.shape_cast %93 : vector<1x2x256xf32> to vector<2x256xf32>
    %cst_19 = arith.constant dense<0.000000e+00> : vector<2x256xf32>
    %95 = tpu.matmul %72, %0, %cst_19 {dimension_numbers = #tpu.dot_dimension_numbers<[1], [0], [0], [1], [0, 0, 1, 1], [], []>} : vector<2x64xf32>, vector<64x256xf32>, vector<2x256xf32> -> vector<2x256xf32>
    %96 = arith.addf %94, %95 : vector<2x256xf32>
    %97 = math.tanh %96 : vector<2x256xf32>
    %98 = arith.negf %96 : vector<2x256xf32>
    %99 = math.exp %98 : vector<2x256xf32>
    %cst_20 = arith.constant 1.000000e+00 : f32
    %100 = vector.broadcast %cst_20 : f32 to vector<2x256xf32>
    %101 = arith.addf %100, %99 : vector<2x256xf32>
    %102 = arith.divf %100, %101 : vector<2x256xf32>
    %103 = arith.select %10, %97, %102 : vector<2x256xi1>, vector<2x256xf32>
    %104 = vector.extract_strided_slice %103 {offsets = [0, 0], sizes = [2, 64], strides = [1, 1]} : vector<2x256xf32> to vector<2x64xf32>
    %105 = vector.extract_strided_slice %103 {offsets = [0, 64], sizes = [2, 64], strides = [1, 1]} : vector<2x256xf32> to vector<2x64xf32>
    %106 = vector.extract_strided_slice %103 {offsets = [0, 128], sizes = [2, 64], strides = [1, 1]} : vector<2x256xf32> to vector<2x64xf32>
    %107 = vector.extract_strided_slice %103 {offsets = [0, 192], sizes = [2, 64], strides = [1, 1]} : vector<2x256xf32> to vector<2x64xf32>
    %108 = arith.mulf %105, %70 : vector<2x64xf32>
    %109 = arith.mulf %104, %106 : vector<2x64xf32>
    %110 = arith.addf %108, %109 : vector<2x64xf32>
    %111 = math.tanh %110 : vector<2x64xf32>
    %112 = arith.mulf %107, %111 : vector<2x64xf32>
    %113 = tpu.concatenate %112, %91 in 1 : vector<2x64xf32>, vector<2x64xf32> -> vector<2x128xf32>
    %cst_21 = arith.constant dense<0.000000e+00> : vector<2x256xf32>
    %114 = tpu.matmul %113, %1, %cst_21 {dimension_numbers = #tpu.dot_dimension_numbers<[1], [0], [0], [1], [0, 0, 1, 1], [], []>} : vector<2x128xf32>, vector<128x256xf32>, vector<2x256xf32> -> vector<2x256xf32>
    %115 = arith.addf %114, %4 : vector<2x256xf32>
    %116 = math.tanh %115 : vector<2x256xf32>
    %117 = arith.negf %115 : vector<2x256xf32>
    %118 = math.exp %117 : vector<2x256xf32>
    %cst_22 = arith.constant 1.000000e+00 : f32
    %119 = vector.broadcast %cst_22 : f32 to vector<2x256xf32>
    %120 = arith.addf %119, %118 : vector<2x256xf32>
    %121 = arith.divf %119, %120 : vector<2x256xf32>
    %122 = arith.select %10, %116, %121 : vector<2x256xi1>, vector<2x256xf32>
    %123 = vector.extract_strided_slice %122 {offsets = [0, 0], sizes = [2, 64], strides = [1, 1]} : vector<2x256xf32> to vector<2x64xf32>
    %124 = vector.extract_strided_slice %122 {offsets = [0, 64], sizes = [2, 64], strides = [1, 1]} : vector<2x256xf32> to vector<2x64xf32>
    %125 = vector.extract_strided_slice %122 {offsets = [0, 128], sizes = [2, 64], strides = [1, 1]} : vector<2x256xf32> to vector<2x64xf32>
    %126 = vector.extract_strided_slice %122 {offsets = [0, 192], sizes = [2, 64], strides = [1, 1]} : vector<2x256xf32> to vector<2x64xf32>
    %127 = arith.mulf %124, %89 : vector<2x64xf32>
    %128 = arith.mulf %123, %125 : vector<2x64xf32>
    %129 = arith.addf %127, %128 : vector<2x64xf32>
    %130 = math.tanh %129 : vector<2x64xf32>
    %131 = arith.mulf %126, %130 : vector<2x64xf32>
    %c3_i32 = arith.constant 3 : i32
    %132 = arith.index_cast %c3_i32 : i32 to index
    %c0_23 = arith.constant 0 : index
    %c0_24 = arith.constant 0 : index
    %133 = vector.load %arg0[%132, %c0_23, %c0_24] : memref<8x2x256xf32, #tpu.memory_space<vmem>>, vector<1x2x256xf32>
    %134 = vector.shape_cast %133 : vector<1x2x256xf32> to vector<2x256xf32>
    %cst_25 = arith.constant dense<0.000000e+00> : vector<2x256xf32>
    %135 = tpu.matmul %112, %0, %cst_25 {dimension_numbers = #tpu.dot_dimension_numbers<[1], [0], [0], [1], [0, 0, 1, 1], [], []>} : vector<2x64xf32>, vector<64x256xf32>, vector<2x256xf32> -> vector<2x256xf32>
    %136 = arith.addf %134, %135 : vector<2x256xf32>
    %137 = math.tanh %136 : vector<2x256xf32>
    %138 = arith.negf %136 : vector<2x256xf32>
    %139 = math.exp %138 : vector<2x256xf32>
    %cst_26 = arith.constant 1.000000e+00 : f32
    %140 = vector.broadcast %cst_26 : f32 to vector<2x256xf32>
    %141 = arith.addf %140, %139 : vector<2x256xf32>
    %142 = arith.divf %140, %141 : vector<2x256xf32>
    %143 = arith.select %10, %137, %142 : vector<2x256xi1>, vector<2x256xf32>
    %144 = vector.extract_strided_slice %143 {offsets = [0, 0], sizes = [2, 64], strides = [1, 1]} : vector<2x256xf32> to vector<2x64xf32>
    %145 = vector.extract_strided_slice %143 {offsets = [0, 64], sizes = [2, 64], strides = [1, 1]} : vector<2x256xf32> to vector<2x64xf32>
    %146 = vector.extract_strided_slice %143 {offsets = [0, 128], sizes = [2, 64], strides = [1, 1]} : vector<2x256xf32> to vector<2x64xf32>
    %147 = vector.extract_strided_slice %143 {offsets = [0, 192], sizes = [2, 64], strides = [1, 1]} : vector<2x256xf32> to vector<2x64xf32>
    %148 = arith.mulf %145, %110 : vector<2x64xf32>
    %149 = arith.mulf %144, %146 : vector<2x64xf32>
    %150 = arith.addf %148, %149 : vector<2x64xf32>
    %151 = math.tanh %150 : vector<2x64xf32>
    %152 = arith.mulf %147, %151 : vector<2x64xf32>
    %153 = tpu.concatenate %152, %131 in 1 : vector<2x64xf32>, vector<2x64xf32> -> vector<2x128xf32>
    %cst_27 = arith.constant dense<0.000000e+00> : vector<2x256xf32>
    %154 = tpu.matmul %153, %1, %cst_27 {dimension_numbers = #tpu.dot_dimension_numbers<[1], [0], [0], [1], [0, 0, 1, 1], [], []>} : vector<2x128xf32>, vector<128x256xf32>, vector<2x256xf32> -> vector<2x256xf32>
    %155 = arith.addf %154, %4 : vector<2x256xf32>
    %156 = math.tanh %155 : vector<2x256xf32>
    %157 = arith.negf %155 : vector<2x256xf32>
    %158 = math.exp %157 : vector<2x256xf32>
    %cst_28 = arith.constant 1.000000e+00 : f32
    %159 = vector.broadcast %cst_28 : f32 to vector<2x256xf32>
    %160 = arith.addf %159, %158 : vector<2x256xf32>
    %161 = arith.divf %159, %160 : vector<2x256xf32>
    %162 = arith.select %10, %156, %161 : vector<2x256xi1>, vector<2x256xf32>
    %163 = vector.extract_strided_slice %162 {offsets = [0, 0], sizes = [2, 64], strides = [1, 1]} : vector<2x256xf32> to vector<2x64xf32>
    %164 = vector.extract_strided_slice %162 {offsets = [0, 64], sizes = [2, 64], strides = [1, 1]} : vector<2x256xf32> to vector<2x64xf32>
    %165 = vector.extract_strided_slice %162 {offsets = [0, 128], sizes = [2, 64], strides = [1, 1]} : vector<2x256xf32> to vector<2x64xf32>
    %166 = vector.extract_strided_slice %162 {offsets = [0, 192], sizes = [2, 64], strides = [1, 1]} : vector<2x256xf32> to vector<2x64xf32>
    %167 = arith.mulf %164, %129 : vector<2x64xf32>
    %168 = arith.mulf %163, %165 : vector<2x64xf32>
    %169 = arith.addf %167, %168 : vector<2x64xf32>
    %170 = math.tanh %169 : vector<2x64xf32>
    %171 = arith.mulf %166, %170 : vector<2x64xf32>
    %c4_i32 = arith.constant 4 : i32
    %172 = arith.index_cast %c4_i32 : i32 to index
    %c0_29 = arith.constant 0 : index
    %c0_30 = arith.constant 0 : index
    %173 = vector.load %arg0[%172, %c0_29, %c0_30] : memref<8x2x256xf32, #tpu.memory_space<vmem>>, vector<1x2x256xf32>
    %174 = vector.shape_cast %173 : vector<1x2x256xf32> to vector<2x256xf32>
    %cst_31 = arith.constant dense<0.000000e+00> : vector<2x256xf32>
    %175 = tpu.matmul %152, %0, %cst_31 {dimension_numbers = #tpu.dot_dimension_numbers<[1], [0], [0], [1], [0, 0, 1, 1], [], []>} : vector<2x64xf32>, vector<64x256xf32>, vector<2x256xf32> -> vector<2x256xf32>
    %176 = arith.addf %174, %175 : vector<2x256xf32>
    %177 = math.tanh %176 : vector<2x256xf32>
    %178 = arith.negf %176 : vector<2x256xf32>
    %179 = math.exp %178 : vector<2x256xf32>
    %cst_32 = arith.constant 1.000000e+00 : f32
    %180 = vector.broadcast %cst_32 : f32 to vector<2x256xf32>
    %181 = arith.addf %180, %179 : vector<2x256xf32>
    %182 = arith.divf %180, %181 : vector<2x256xf32>
    %183 = arith.select %10, %177, %182 : vector<2x256xi1>, vector<2x256xf32>
    %184 = vector.extract_strided_slice %183 {offsets = [0, 0], sizes = [2, 64], strides = [1, 1]} : vector<2x256xf32> to vector<2x64xf32>
    %185 = vector.extract_strided_slice %183 {offsets = [0, 64], sizes = [2, 64], strides = [1, 1]} : vector<2x256xf32> to vector<2x64xf32>
    %186 = vector.extract_strided_slice %183 {offsets = [0, 128], sizes = [2, 64], strides = [1, 1]} : vector<2x256xf32> to vector<2x64xf32>
    %187 = vector.extract_strided_slice %183 {offsets = [0, 192], sizes = [2, 64], strides = [1, 1]} : vector<2x256xf32> to vector<2x64xf32>
    %188 = arith.mulf %185, %150 : vector<2x64xf32>
    %189 = arith.mulf %184, %186 : vector<2x64xf32>
    %190 = arith.addf %188, %189 : vector<2x64xf32>
    %191 = math.tanh %190 : vector<2x64xf32>
    %192 = arith.mulf %187, %191 : vector<2x64xf32>
    %193 = tpu.concatenate %192, %171 in 1 : vector<2x64xf32>, vector<2x64xf32> -> vector<2x128xf32>
    %cst_33 = arith.constant dense<0.000000e+00> : vector<2x256xf32>
    %194 = tpu.matmul %193, %1, %cst_33 {dimension_numbers = #tpu.dot_dimension_numbers<[1], [0], [0], [1], [0, 0, 1, 1], [], []>} : vector<2x128xf32>, vector<128x256xf32>, vector<2x256xf32> -> vector<2x256xf32>
    %195 = arith.addf %194, %4 : vector<2x256xf32>
    %196 = math.tanh %195 : vector<2x256xf32>
    %197 = arith.negf %195 : vector<2x256xf32>
    %198 = math.exp %197 : vector<2x256xf32>
    %cst_34 = arith.constant 1.000000e+00 : f32
    %199 = vector.broadcast %cst_34 : f32 to vector<2x256xf32>
    %200 = arith.addf %199, %198 : vector<2x256xf32>
    %201 = arith.divf %199, %200 : vector<2x256xf32>
    %202 = arith.select %10, %196, %201 : vector<2x256xi1>, vector<2x256xf32>
    %203 = vector.extract_strided_slice %202 {offsets = [0, 0], sizes = [2, 64], strides = [1, 1]} : vector<2x256xf32> to vector<2x64xf32>
    %204 = vector.extract_strided_slice %202 {offsets = [0, 64], sizes = [2, 64], strides = [1, 1]} : vector<2x256xf32> to vector<2x64xf32>
    %205 = vector.extract_strided_slice %202 {offsets = [0, 128], sizes = [2, 64], strides = [1, 1]} : vector<2x256xf32> to vector<2x64xf32>
    %206 = vector.extract_strided_slice %202 {offsets = [0, 192], sizes = [2, 64], strides = [1, 1]} : vector<2x256xf32> to vector<2x64xf32>
    %207 = arith.mulf %204, %169 : vector<2x64xf32>
    %208 = arith.mulf %203, %205 : vector<2x64xf32>
    %209 = arith.addf %207, %208 : vector<2x64xf32>
    %210 = math.tanh %209 : vector<2x64xf32>
    %211 = arith.mulf %206, %210 : vector<2x64xf32>
    %c5_i32 = arith.constant 5 : i32
    %212 = arith.index_cast %c5_i32 : i32 to index
    %c0_35 = arith.constant 0 : index
    %c0_36 = arith.constant 0 : index
    %213 = vector.load %arg0[%212, %c0_35, %c0_36] : memref<8x2x256xf32, #tpu.memory_space<vmem>>, vector<1x2x256xf32>
    %214 = vector.shape_cast %213 : vector<1x2x256xf32> to vector<2x256xf32>
    %cst_37 = arith.constant dense<0.000000e+00> : vector<2x256xf32>
    %215 = tpu.matmul %192, %0, %cst_37 {dimension_numbers = #tpu.dot_dimension_numbers<[1], [0], [0], [1], [0, 0, 1, 1], [], []>} : vector<2x64xf32>, vector<64x256xf32>, vector<2x256xf32> -> vector<2x256xf32>
    %216 = arith.addf %214, %215 : vector<2x256xf32>
    %217 = math.tanh %216 : vector<2x256xf32>
    %218 = arith.negf %216 : vector<2x256xf32>
    %219 = math.exp %218 : vector<2x256xf32>
    %cst_38 = arith.constant 1.000000e+00 : f32
    %220 = vector.broadcast %cst_38 : f32 to vector<2x256xf32>
    %221 = arith.addf %220, %219 : vector<2x256xf32>
    %222 = arith.divf %220, %221 : vector<2x256xf32>
    %223 = arith.select %10, %217, %222 : vector<2x256xi1>, vector<2x256xf32>
    %224 = vector.extract_strided_slice %223 {offsets = [0, 0], sizes = [2, 64], strides = [1, 1]} : vector<2x256xf32> to vector<2x64xf32>
    %225 = vector.extract_strided_slice %223 {offsets = [0, 64], sizes = [2, 64], strides = [1, 1]} : vector<2x256xf32> to vector<2x64xf32>
    %226 = vector.extract_strided_slice %223 {offsets = [0, 128], sizes = [2, 64], strides = [1, 1]} : vector<2x256xf32> to vector<2x64xf32>
    %227 = vector.extract_strided_slice %223 {offsets = [0, 192], sizes = [2, 64], strides = [1, 1]} : vector<2x256xf32> to vector<2x64xf32>
    %228 = arith.mulf %225, %190 : vector<2x64xf32>
    %229 = arith.mulf %224, %226 : vector<2x64xf32>
    %230 = arith.addf %228, %229 : vector<2x64xf32>
    %231 = math.tanh %230 : vector<2x64xf32>
    %232 = arith.mulf %227, %231 : vector<2x64xf32>
    %233 = tpu.concatenate %232, %211 in 1 : vector<2x64xf32>, vector<2x64xf32> -> vector<2x128xf32>
    %cst_39 = arith.constant dense<0.000000e+00> : vector<2x256xf32>
    %234 = tpu.matmul %233, %1, %cst_39 {dimension_numbers = #tpu.dot_dimension_numbers<[1], [0], [0], [1], [0, 0, 1, 1], [], []>} : vector<2x128xf32>, vector<128x256xf32>, vector<2x256xf32> -> vector<2x256xf32>
    %235 = arith.addf %234, %4 : vector<2x256xf32>
    %236 = math.tanh %235 : vector<2x256xf32>
    %237 = arith.negf %235 : vector<2x256xf32>
    %238 = math.exp %237 : vector<2x256xf32>
    %cst_40 = arith.constant 1.000000e+00 : f32
    %239 = vector.broadcast %cst_40 : f32 to vector<2x256xf32>
    %240 = arith.addf %239, %238 : vector<2x256xf32>
    %241 = arith.divf %239, %240 : vector<2x256xf32>
    %242 = arith.select %10, %236, %241 : vector<2x256xi1>, vector<2x256xf32>
    %243 = vector.extract_strided_slice %242 {offsets = [0, 0], sizes = [2, 64], strides = [1, 1]} : vector<2x256xf32> to vector<2x64xf32>
    %244 = vector.extract_strided_slice %242 {offsets = [0, 64], sizes = [2, 64], strides = [1, 1]} : vector<2x256xf32> to vector<2x64xf32>
    %245 = vector.extract_strided_slice %242 {offsets = [0, 128], sizes = [2, 64], strides = [1, 1]} : vector<2x256xf32> to vector<2x64xf32>
    %246 = vector.extract_strided_slice %242 {offsets = [0, 192], sizes = [2, 64], strides = [1, 1]} : vector<2x256xf32> to vector<2x64xf32>
    %247 = arith.mulf %244, %209 : vector<2x64xf32>
    %248 = arith.mulf %243, %245 : vector<2x64xf32>
    %249 = arith.addf %247, %248 : vector<2x64xf32>
    %250 = math.tanh %249 : vector<2x64xf32>
    %251 = arith.mulf %246, %250 : vector<2x64xf32>
    %c6_i32 = arith.constant 6 : i32
    %252 = arith.index_cast %c6_i32 : i32 to index
    %c0_41 = arith.constant 0 : index
    %c0_42 = arith.constant 0 : index
    %253 = vector.load %arg0[%252, %c0_41, %c0_42] : memref<8x2x256xf32, #tpu.memory_space<vmem>>, vector<1x2x256xf32>
    %254 = vector.shape_cast %253 : vector<1x2x256xf32> to vector<2x256xf32>
    %cst_43 = arith.constant dense<0.000000e+00> : vector<2x256xf32>
    %255 = tpu.matmul %232, %0, %cst_43 {dimension_numbers = #tpu.dot_dimension_numbers<[1], [0], [0], [1], [0, 0, 1, 1], [], []>} : vector<2x64xf32>, vector<64x256xf32>, vector<2x256xf32> -> vector<2x256xf32>
    %256 = arith.addf %254, %255 : vector<2x256xf32>
    %257 = math.tanh %256 : vector<2x256xf32>
    %258 = arith.negf %256 : vector<2x256xf32>
    %259 = math.exp %258 : vector<2x256xf32>
    %cst_44 = arith.constant 1.000000e+00 : f32
    %260 = vector.broadcast %cst_44 : f32 to vector<2x256xf32>
    %261 = arith.addf %260, %259 : vector<2x256xf32>
    %262 = arith.divf %260, %261 : vector<2x256xf32>
    %263 = arith.select %10, %257, %262 : vector<2x256xi1>, vector<2x256xf32>
    %264 = vector.extract_strided_slice %263 {offsets = [0, 0], sizes = [2, 64], strides = [1, 1]} : vector<2x256xf32> to vector<2x64xf32>
    %265 = vector.extract_strided_slice %263 {offsets = [0, 64], sizes = [2, 64], strides = [1, 1]} : vector<2x256xf32> to vector<2x64xf32>
    %266 = vector.extract_strided_slice %263 {offsets = [0, 128], sizes = [2, 64], strides = [1, 1]} : vector<2x256xf32> to vector<2x64xf32>
    %267 = vector.extract_strided_slice %263 {offsets = [0, 192], sizes = [2, 64], strides = [1, 1]} : vector<2x256xf32> to vector<2x64xf32>
    %268 = arith.mulf %265, %230 : vector<2x64xf32>
    %269 = arith.mulf %264, %266 : vector<2x64xf32>
    %270 = arith.addf %268, %269 : vector<2x64xf32>
    %271 = math.tanh %270 : vector<2x64xf32>
    %272 = arith.mulf %267, %271 : vector<2x64xf32>
    %273 = tpu.concatenate %272, %251 in 1 : vector<2x64xf32>, vector<2x64xf32> -> vector<2x128xf32>
    %cst_45 = arith.constant dense<0.000000e+00> : vector<2x256xf32>
    %274 = tpu.matmul %273, %1, %cst_45 {dimension_numbers = #tpu.dot_dimension_numbers<[1], [0], [0], [1], [0, 0, 1, 1], [], []>} : vector<2x128xf32>, vector<128x256xf32>, vector<2x256xf32> -> vector<2x256xf32>
    %275 = arith.addf %274, %4 : vector<2x256xf32>
    %276 = math.tanh %275 : vector<2x256xf32>
    %277 = arith.negf %275 : vector<2x256xf32>
    %278 = math.exp %277 : vector<2x256xf32>
    %cst_46 = arith.constant 1.000000e+00 : f32
    %279 = vector.broadcast %cst_46 : f32 to vector<2x256xf32>
    %280 = arith.addf %279, %278 : vector<2x256xf32>
    %281 = arith.divf %279, %280 : vector<2x256xf32>
    %282 = arith.select %10, %276, %281 : vector<2x256xi1>, vector<2x256xf32>
    %283 = vector.extract_strided_slice %282 {offsets = [0, 0], sizes = [2, 64], strides = [1, 1]} : vector<2x256xf32> to vector<2x64xf32>
    %284 = vector.extract_strided_slice %282 {offsets = [0, 64], sizes = [2, 64], strides = [1, 1]} : vector<2x256xf32> to vector<2x64xf32>
    %285 = vector.extract_strided_slice %282 {offsets = [0, 128], sizes = [2, 64], strides = [1, 1]} : vector<2x256xf32> to vector<2x64xf32>
    %286 = vector.extract_strided_slice %282 {offsets = [0, 192], sizes = [2, 64], strides = [1, 1]} : vector<2x256xf32> to vector<2x64xf32>
    %287 = arith.mulf %284, %249 : vector<2x64xf32>
    %288 = arith.mulf %283, %285 : vector<2x64xf32>
    %289 = arith.addf %287, %288 : vector<2x64xf32>
    %290 = math.tanh %289 : vector<2x64xf32>
    %291 = arith.mulf %286, %290 : vector<2x64xf32>
    %c7_i32 = arith.constant 7 : i32
    %292 = arith.index_cast %c7_i32 : i32 to index
    %c0_47 = arith.constant 0 : index
    %c0_48 = arith.constant 0 : index
    %293 = vector.load %arg0[%292, %c0_47, %c0_48] : memref<8x2x256xf32, #tpu.memory_space<vmem>>, vector<1x2x256xf32>
    %294 = vector.shape_cast %293 : vector<1x2x256xf32> to vector<2x256xf32>
    %cst_49 = arith.constant dense<0.000000e+00> : vector<2x256xf32>
    %295 = tpu.matmul %272, %0, %cst_49 {dimension_numbers = #tpu.dot_dimension_numbers<[1], [0], [0], [1], [0, 0, 1, 1], [], []>} : vector<2x64xf32>, vector<64x256xf32>, vector<2x256xf32> -> vector<2x256xf32>
    %296 = arith.addf %294, %295 : vector<2x256xf32>
    %297 = math.tanh %296 : vector<2x256xf32>
    %298 = arith.negf %296 : vector<2x256xf32>
    %299 = math.exp %298 : vector<2x256xf32>
    %cst_50 = arith.constant 1.000000e+00 : f32
    %300 = vector.broadcast %cst_50 : f32 to vector<2x256xf32>
    %301 = arith.addf %300, %299 : vector<2x256xf32>
    %302 = arith.divf %300, %301 : vector<2x256xf32>
    %303 = arith.select %10, %297, %302 : vector<2x256xi1>, vector<2x256xf32>
    %304 = vector.extract_strided_slice %303 {offsets = [0, 0], sizes = [2, 64], strides = [1, 1]} : vector<2x256xf32> to vector<2x64xf32>
    %305 = vector.extract_strided_slice %303 {offsets = [0, 64], sizes = [2, 64], strides = [1, 1]} : vector<2x256xf32> to vector<2x64xf32>
    %306 = vector.extract_strided_slice %303 {offsets = [0, 128], sizes = [2, 64], strides = [1, 1]} : vector<2x256xf32> to vector<2x64xf32>
    %307 = vector.extract_strided_slice %303 {offsets = [0, 192], sizes = [2, 64], strides = [1, 1]} : vector<2x256xf32> to vector<2x64xf32>
    %308 = arith.mulf %305, %270 : vector<2x64xf32>
    %309 = arith.mulf %304, %306 : vector<2x64xf32>
    %310 = arith.addf %308, %309 : vector<2x64xf32>
    %311 = math.tanh %310 : vector<2x64xf32>
    %312 = arith.mulf %307, %311 : vector<2x64xf32>
    %313 = tpu.concatenate %312, %291 in 1 : vector<2x64xf32>, vector<2x64xf32> -> vector<2x128xf32>
    %cst_51 = arith.constant dense<0.000000e+00> : vector<2x256xf32>
    %314 = tpu.matmul %313, %1, %cst_51 {dimension_numbers = #tpu.dot_dimension_numbers<[1], [0], [0], [1], [0, 0, 1, 1], [], []>} : vector<2x128xf32>, vector<128x256xf32>, vector<2x256xf32> -> vector<2x256xf32>
    %315 = arith.addf %314, %4 : vector<2x256xf32>
    %316 = math.tanh %315 : vector<2x256xf32>
    %317 = arith.negf %315 : vector<2x256xf32>
    %318 = math.exp %317 : vector<2x256xf32>
    %cst_52 = arith.constant 1.000000e+00 : f32
    %319 = vector.broadcast %cst_52 : f32 to vector<2x256xf32>
    %320 = arith.addf %319, %318 : vector<2x256xf32>
    %321 = arith.divf %319, %320 : vector<2x256xf32>
    %322 = arith.select %10, %316, %321 : vector<2x256xi1>, vector<2x256xf32>
    %323 = vector.extract_strided_slice %322 {offsets = [0, 0], sizes = [2, 64], strides = [1, 1]} : vector<2x256xf32> to vector<2x64xf32>
    %324 = vector.extract_strided_slice %322 {offsets = [0, 64], sizes = [2, 64], strides = [1, 1]} : vector<2x256xf32> to vector<2x64xf32>
    %325 = vector.extract_strided_slice %322 {offsets = [0, 128], sizes = [2, 64], strides = [1, 1]} : vector<2x256xf32> to vector<2x64xf32>
    %326 = vector.extract_strided_slice %322 {offsets = [0, 192], sizes = [2, 64], strides = [1, 1]} : vector<2x256xf32> to vector<2x64xf32>
    %327 = arith.mulf %324, %289 : vector<2x64xf32>
    %328 = arith.mulf %323, %325 : vector<2x64xf32>
    %329 = arith.addf %327, %328 : vector<2x64xf32>
    %330 = math.tanh %329 : vector<2x64xf32>
    %331 = arith.mulf %326, %330 : vector<2x64xf32>
    %c8_i32 = arith.constant 8 : i32
    %c0_53 = arith.constant 0 : index
    %c0_54 = arith.constant 0 : index
    %332 = vector.load %arg4[%c0_53, %c0_54] : memref<1x64xf32, #tpu.memory_space<vmem>>, vector<1x64xf32>
    %333 = vector.broadcast %332 : vector<1x64xf32> to vector<2x64xf32>
    %334 = arith.mulf %331, %333 : vector<2x64xf32>
    %cst_55 = arith.constant dense<0.000000e+00> : vector<2xf32>
    %335 = vector.multi_reduction <add>, %334, %cst_55 [1] : vector<2x64xf32> to vector<2xf32>
    %336 = vector.shape_cast %335 : vector<2xf32> to vector<2x1xf32>
    %c0_56 = arith.constant 0 : index
    %c0_57 = arith.constant 0 : index
    %337 = vector.load %arg5[%c0_56, %c0_57] : memref<1x1xf32, #tpu.memory_space<vmem>>, vector<1x1xf32>
    %338 = vector.broadcast %337 : vector<1x1xf32> to vector<2x1xf32>
    %339 = arith.addf %336, %338 : vector<2x1xf32>
    %c0_58 = arith.constant 0 : index
    %c0_59 = arith.constant 0 : index
    %340 = vector.load %arg6[%c0_58, %c0_59] : memref<2x1xf32, #tpu.memory_space<vmem>>, vector<2x1xf32>
    tpu.vector_store %arg6[%c0_58, %c0_59], %339 {strides = array<i32>} : memref<2x1xf32, #tpu.memory_space<vmem>>, vector<2x1xf32>,
    return
  }
}

</mosaic_0001>

<bundles_post_ra>
// kernel: lstm_model_forward.1
= control target key start
LH: loop header
LB: loop body
LE: loop exit
PB: predicated region body
PF: predicated region fallthrough
CT: control target
= control target key end

     0   :  { %s3201_s0 = inlined_call_operand.vmem [shape: f32[8,2,256], index: 0, kind: input, shape index: {}]   ;;  %s3202_s1 = inlined_call_operand.vmem [shape: f32[64,256], index: 1, kind: input, shape index: {}]   ;;  %s3203_s2 = inlined_call_operand.hbm [shape: f32[128,256], index: 2, kind: input, shape index: {}]   ;;  %s3204_s3 = inlined_call_operand.vmem [shape: f32[1,256], index: 3, kind: input, shape index: {}]   ;;  %s3205_s4 = inlined_call_operand.vmem [shape: f32[1,64], index: 4, kind: input, shape index: {}]   ;;  %s3206_s5 = inlined_call_operand.<no memory space> [shape: f32[1,1], index: 5, kind: input, shape index: {}]   ;;  %s3207_s6 = inlined_call_operand.vmem [shape: f32[2,1], index: 6, kind: output, shape index: {}]  }
   0x1   :  { %v11_v0 = vstv %s3206_s5 }
   0x2   :  { %12 = vst [vmem:[#allocation2] sm:$0x1] %v11_v0 }
   0x3   :  { %13 = vsyncpa [#allocation4], 0  ;;  %s2243_s23 = smov [#allocation3]  }
   0x4   :  { %s23_s24 = sshll.u32 %s2243_s23, 4  ;;  %s24_s24 = int_to_ptr.vmem [resolvable:$true] %s23_s24 }
   0x5   :  { %s2229_s25 = scalar_lea.vmem %s24_s24, 4096  ;;  %p2234_p1 = scmp.lt.s32.totalorder %s24_s24, %s24_s24 }
   0x6   :  { %p2230_p0 = scmp.ne.s32.totalorder %s24_s24, %s2229_s25  ;;  %p2235_p2 = scmp.lt.s32.totalorder %s2229_s25, %s2229_s25 }
   0x8   :  { %p2236_p3 = por %p2235_p2, %p2234_p1 }
   0xa   :  { %p2237_p4 = pnand %p2236_p3, %p2230_p0 }
   0xc   :  { %2240 = shalt.err (!%p2237_p4)
}
   0xd   :  { %s2244_s26 = smov 256   ;;  %s2245_s27 = smov 16  }
   0xe   :  { %29 = dma.hbm_to_vmem [thread:$0]  %s3203_s2, 4096, %s24_s24, [#allocation4], %s2244_s26, %s2244_s26, %s2245_s27  }
   0xf   :  { %2241 = dma.done.wait [#allocation4], 4096  }
  0x10   :  { %2242 = vsyncadd [#allocation4], 4294963200  ;;  %v3208_v1 = vmov 0.0   ;;  %v2295_v2 = vld [vmem:[%s3202_s1 + $0x78] sm:$0xff]  ;;  %v2300_v3 = vld [vmem:[%s3202_s1 + $0x70] sm:$0xff]  ;;  %v89_v18 = vlaneseq  ;;  %s2248_s12 = smov 64  }
  0x11   :  { %177 = vmatprep.mubr.f32.mxu1 %v3208_v1  ;;  %405 = vmatprep.mubr.f32.mxu0 %v3208_v1  ;;  %v2305_v4 = vld [vmem:[%s3202_s1 + $0x68] sm:$0xff]  ;;  %v2311_v5 = vld [vmem:[%s3202_s1 + $0x60] sm:$0xff]  ;;  %v2318_v6 = vld [vmem:[%s3202_s1 + $0x58] sm:$0xff]  ;;  %v2247_v19 = vmov 1983009808   ;;  %vm109_vm1 = vcmask 523264  }
  0x12   :  { %129 = vmatprep.subr.mxu1 %v2295_v2  ;;  %357 = vmatprep.subr.mxu0 %v2295_v2  ;;  %v2325_v7 = vld [vmem:[%s3202_s1 + $0x50] sm:$0xff]  ;;  %v2332_v8 = vld [vmem:[%s3202_s1 + $0x48] sm:$0xff]  ;;  %v2339_v9 = vld [vmem:[%s3202_s1 + $0x40] sm:$0xff]  ;;  %v188_v20 = vunpack.c.l.s4 %v2247_v19  ;;  %v2406_v21 = vshrl.u32 %v89_v18, 7  ;;  %v100_v33 = vand.u32 127, %v89_v18  ;;  %vm1947_vm2 = vcmask 517120  }
  0x13   :  { %130 = vmatpush1.msra.mxu1 %v2300_v3  ;;  %358 = vmatpush1.msra.mxu0 %v2300_v3  ;;  %v2346_v10 = vld [vmem:[%s3202_s1 + $0x38] sm:$0xff]  ;;  %v2353_v11 = vld [vmem:[%s3202_s1 + $0x30] sm:$0xff]  ;;  %v2360_v12 = vld [vmem:[%s3202_s1 + $0x28] sm:$0xff]  ;;  %vm1959_vm3 = vcmask 1024  }
  0x14   :  { %131 = vmatprep.subr.mxu1 %v2305_v4  ;;  %359 = vmatprep.subr.mxu0 %v2305_v4  ;;  %v2367_v13 = vld [vmem:[%s3202_s1 + $0x20] sm:$0xff]  ;;  %v2374_v14 = vld [vmem:[%s3202_s1 + $0x18] sm:$0xff]  ;;  %v2381_v15 = vld [vmem:[%s3202_s1 + $0x10] sm:$0xff]  ;;  %v189_v22 = vunpack.c.0.s8 %v188_v20  ;;  %v2415_v35 = vadd.s32 128, %v100_v33 }
  0x15   :  { %132 = vmatpush1.msra.mxu1 %v2311_v5  ;;  %360 = vmatpush1.msra.mxu0 %v2311_v5  ;;  %3237 = vst [vmem:[#allocation6_spill] sm:$0xff] %v2367_v13  ;;  %3238 = vst [vmem:[#allocation7_spill] sm:$0xff] %v2374_v14  ;;  %v2388_v16 = vld [vmem:[%s3202_s1 + $0x8] sm:$0xff]  ;;  %v2395_v17 = vld [vmem:[%s3202_s1] sm:$0xff] }
  0x16   :  { %133 = vmatprep.subr.mxu1 %v2318_v6  ;;  %361 = vmatprep.subr.mxu0 %v2318_v6  ;;  %3239 = vst [vmem:[#allocation8_spill] sm:$0xff] %v2381_v15  ;;  %3240 = vst [vmem:[#allocation9_spill] sm:$0xff] %v2388_v16  ;;  %v2409_v24 = vsub.s32 %v189_v22, %v2406_v21  ;;  %v108_v27 = vld [vmem:[%s3201_s0] sm:$0xf]  ;;  %vm105_vm0 = vcmp.lt.s32.totalorder %v2415_v35, 192  ;;  %v2433_v44 = vld [vmem:[#allocation3 + $0xf0] sm:$0xff] }
  0x17   :  { %134 = vmatpush1.msra.mxu1 %v2325_v7  ;;  %362 = vmatpush1.msra.mxu0 %v2325_v7  ;;  %3241 = vst [vmem:[#allocation10_spill] sm:$0xff] %v2395_v17  ;;  %v2431_v43 = vld [vmem:[#allocation3 + $0xf8] sm:$0xff]  ;;  %v2435_v45 = vld [vmem:[#allocation3 + $0xe8] sm:$0xff]  ;;  %v2438_v46 = vld [vmem:[#allocation3 + $0xe0] sm:$0xff] }
  0x18   :  { %135 = vmatprep.subr.mxu1 %v2332_v8  ;;  %363 = vmatprep.subr.mxu0 %v2332_v8  ;;  %3242 = vst [vmem:[#allocation11_spill] sm:$0xff] %v2409_v24  ;;  %3243 = vst [vmem:[#allocation12_spill] sm:$0xff] %v2431_v43  ;;  %v2442_v47 = vld [vmem:[#allocation3 + $0xd8] sm:$0xff]  ;;  %v2445_v48 = vld [vmem:[#allocation3 + $0xd0] sm:$0xff] }
  0x19   :  { %136 = vmatpush1.msra.mxu1 %v2339_v9  ;;  %364 = vmatpush1.msra.mxu0 %v2339_v9  ;;  %v2448_v49 = vld [vmem:[#allocation3 + $0xc8] sm:$0xff]  ;;  %v2451_v50 = vld [vmem:[#allocation3 + $0xc0] sm:$0xff]  ;;  %v2454_v51 = vld [vmem:[#allocation3 + $0xb8] sm:$0xff] }
  0x1a   :  { %137 = vmatprep.subr.mxu1 %v2346_v10  ;;  %365 = vmatprep.subr.mxu0 %v2346_v10  ;;  %v2457_v52 = vld [vmem:[#allocation3 + $0xb0] sm:$0xff]  ;;  %v2460_v53 = vld [vmem:[#allocation3 + $0xa8] sm:$0xff]  ;;  %v2463_v54 = vld [vmem:[#allocation3 + $0xa0] sm:$0xff] }
  0x1b   :  { %138 = vmatpush1.msra.mxu1 %v2353_v11  ;;  %366 = vmatpush1.msra.mxu0 %v2353_v11  ;;  %v2466_v55 = vld [vmem:[#allocation3 + $0x98] sm:$0xff]  ;;  %v2469_v56 = vld [vmem:[#allocation3 + $0x90] sm:$0xff]  ;;  %v2472_v57 = vld [vmem:[#allocation3 + $0x88] sm:$0xff] }
  0x1c   :  { %139 = vmatprep.subr.mxu1 %v2360_v12  ;;  %367 = vmatprep.subr.mxu0 %v2360_v12  ;;  %v2475_v58 = vld [vmem:[#allocation3 + $0x80] sm:$0xff]  ;;  %v2478_v59 = vld [vmem:[#allocation3 + $0x78] sm:$0xff]  ;;  %v2481_v60 = vld [vmem:[#allocation3 + $0x70] sm:$0xff] }
  0x1d   :  { %140 = vmatpush1.msra.mxu1 %v2367_v13  ;;  %368 = vmatpush1.msra.mxu0 %v2367_v13  ;;  %v2484_v61 = vld [vmem:[#allocation3 + $0x68] sm:$0xff]  ;;  %v2487_v62 = vld [vmem:[#allocation3 + $0x60] sm:$0xff]  ;;  %v2490_v63 = vld [vmem:[#allocation3 + $0x58] sm:$0xff] }
  0x1e   :  { %141 = vmatprep.subr.mxu1 %v2374_v14  ;;  %369 = vmatprep.subr.mxu0 %v2374_v14  ;;  %v2493_v0 = vld [vmem:[#allocation3 + $0x50] sm:$0xff]  ;;  %v2496_v18 = vld [vmem:[#allocation3 + $0x48] sm:$0xff]  ;;  %v2499_v19 = vld [vmem:[#allocation3 + $0x40] sm:$0xff] }
  0x1f   :  { %142 = vmatpush1.msra.mxu1 %v2381_v15  ;;  %370 = vmatpush1.msra.mxu0 %v2381_v15  ;;  %v2502_v20 = vld [vmem:[#allocation3 + $0x38] sm:$0xff]  ;;  %v2505_v22 = vld [vmem:[#allocation3 + $0x30] sm:$0xff] }
  0x20   :  { %143 = vmatprep.subr.mxu1 %v2388_v16  ;;  %371 = vmatprep.subr.mxu0 %v2388_v16 }
  0x21   :  { %144 = vmatpush1.msra.mxu1 %v2395_v17  ;;  %372 = vmatpush1.msra.mxu0 %v2395_v17 }
  0x22   :  { %178 = vmatmul.mubr.f32.vlgmr.msra.gmra.mxu1 %v3208_v1  ;;  %241 = vmatprep.subr.mxu1 %v2431_v43 }
  0x23   :  { %305 = vmatprep.mubr.f32.mxu1 %v3208_v1  ;;  %469 = vmatprep.subr.mxu0 %v2431_v43 }
  0x24   :  { %242 = vmatpush1.msra.mxu1 %v2433_v44 }
  0x25   :  { %243 = vmatprep.subr.mxu1 %v2435_v45 }
  0x26   :  { %244 = vmatpush1.msra.mxu1 %v2438_v46 }
  0x27   :  { %245 = vmatprep.subr.mxu1 %v2442_v47 }
  0x28   :  { %246 = vmatpush1.msra.mxu1 %v2445_v48 }
  0x29   :  { %247 = vmatprep.subr.mxu1 %v2448_v49 }
  0x2a   :  { %248 = vmatpush1.msra.mxu1 %v2451_v50 }
  0x2b   :  { %249 = vmatprep.subr.mxu1 %v2454_v51 }
  0x2c   :  { %250 = vmatpush1.msra.mxu1 %v2457_v52 }
  0x2d   :  { %251 = vmatprep.subr.mxu1 %v2460_v53 }
  0x2e   :  { %252 = vmatpush1.msra.mxu1 %v2463_v54 }
  0x2f   :  { %253 = vmatprep.subr.mxu1 %v2466_v55 }
  0x30   :  { %254 = vmatpush1.msra.mxu1 %v2469_v56 }
  0x31   :  { %255 = vmatprep.subr.mxu1 %v2472_v57 }
  0x32   :  { %256 = vmatpush1.msra.mxu1 %v2475_v58 }
  0x33   :  { %257 = vmatprep.subr.mxu1 %v2478_v59 }
  0x34   :  { %258 = vmatpush1.msra.mxu1 %v2481_v60 }
  0x35   :  { %259 = vmatprep.subr.mxu1 %v2484_v61 }
  0x36   :  { %260 = vmatpush1.msra.mxu1 %v2487_v62 }
  0x37   :  { %261 = vmatprep.subr.mxu1 %v2490_v63 }
  0x38   :  { %262 = vmatpush1.msra.mxu1 %v2493_v0 }
  0x39   :  { %263 = vmatprep.subr.mxu1 %v2496_v18 }
  0x3a   :  { %264 = vmatpush1.msra.mxu1 %v2499_v19 }
  0x3b   :  { %265 = vmatprep.subr.mxu1 %v2502_v20 }
  0x3c   :  { %266 = vmatpush1.msra.mxu1 %v2505_v22 }
  0xe2   :  { %v179_v23 = vpop.f32.mrf.mxu1 }
  0xe4   :  { %v181_v25 = vpop.f32.mrf.mxu1 }
  0xe5   :  { %v186_v26 = vcombine.low %v179_v23, %v181_v25  ;;  %v2508_v23 = vld [vmem:[#allocation3 + $0x28] sm:$0xff]  ;;  %v2511_v25 = vld [vmem:[#allocation3 + $0x20] sm:$0xff] }
  0xe6   :  { %3244 = vst [vmem:[#allocation13_spill] sm:$0xff] %v2508_v23  ;;  %3245 = vst [vmem:[#allocation14_spill] sm:$0xff] %v2511_v25  ;;  %267 = vmatprep.subr.mxu1 %v2508_v23 }
  0xe7   :  { %v193_v28 = vrot.slane %v186_v26, %v2409_v24  ;;  %v2514_v26 = vld [vmem:[#allocation3 + $0x18] sm:$0xff]  ;;  %268 = vmatpush1.msra.mxu1 %v2511_v25 }
  0xe8   :  { %3246 = vst [vmem:[#allocation15_spill] sm:$0xff] %v2514_v26  ;;  %269 = vmatprep.subr.mxu1 %v2514_v26 }
  0xe9   :  { %v195_v29 = vadd.f32 %v193_v28, %v108_v27  ;;  %v2517_v27 = vld [vmem:[#allocation3 + $0x10] sm:$0xff]  ;;  %v2520_v28 = vld [vmem:[#allocation3 + $0x8] sm:$0xff] }
  0xea   :  { %3247 = vst [vmem:[#allocation16_spill] sm:$0xff] %v2517_v27  ;;  %3248 = vst [vmem:[#allocation17_spill] sm:$0xff] %v2520_v28  ;;  %270 = vmatpush1.msra.mxu1 %v2517_v27 }
  0xeb   :  { %v1966_v30 = vmul.f32 -1.442695, %v195_v29  ;;  %271 = vmatprep.subr.mxu1 %v2520_v28 }
  0xed   :  { %2013 = vpow2.f32 %v1966_v30 }
  0xee   :  { %2015 = vtanh.f32 %v195_v29  ;;  %v2523_v29 = vld [vmem:[#allocation3] sm:$0xff] }
  0xef   :  { %3249 = vst [vmem:[#allocation18_spill] sm:$0xff] %v2523_v29  ;;  %272 = vmatpush1.msra.mxu1 %v2523_v29 }
  0xf0   :  { %585 = vmatprep.subr.mxu1 %v2295_v2 }
  0xfa   :  { %v2014_v31 = vpop.eup %2013 }
  0xfb   :  { %v200_v32 = vadd.f32 1.0, %v2014_v31  ;;  %v2016_v34 = vpop.eup %2015 }
  0xfc   :  { %v210_v36 = vrot.slane %v2016_v34, %v2409_v24 }
  0xfd   :  { %2017 = vrcp.f32 %v200_v32 }
  0xfe   :  { %v211_v39 = vcombine.high %v210_v36, %v210_v36 }
 0x10a   :  { %v2018_v37 = vpop.eup %2017 }
 0x10b   :  { %v2419_v38 = vrot.slane %v2018_v37, %v2409_v24 }
 0x10d   :  { %v222_v40 = vcombine.high %v2419_v38, %v2419_v38  ;;  %v227_v30 = vmul.f32 0.0, %v2419_v38 }
 0x10f   :  { %v2426_v41 = vsel %vm105_vm0, %v211_v39, %v222_v40  ;;  %v1970_v40 = vld [vmem:[%s3201_s0 + $0x4] sm:$0xf] }
 0x110   :  { %v228_v42 = vmul.f32 %v2426_v41, %v2419_v38 }
 0x112   :  { %230 = vrot.lane.b32.xlu0 %v228_v42, %s2248_s12 }
 0x184   :  { %v231_v31 = vpop.permute.xlu0 %230 }
 0x185   :  { %v2530_v32 = vadd.f32 %v231_v31, %v227_v30 }
 0x187   :  { %2019 = vtanh.f32 %v2530_v32 }
 0x194   :  { %v2020_v33 = vpop.eup %2019 }
 0x195   :  { %v235_v34 = vmul.f32 %v2020_v33, %v2426_v41 }
 0x197   :  { %237 = vrot.lane.b32.xlu0 %v235_v34, %s2248_s12 }
 0x209   :  { %v238_v36 = vpop.permute.xlu0 %237 }
 0x20a   :  { %1967 = vmatmul.mubr.msk.f32.vlgmr.msra.gmra.mxu1 %vm109_vm1, %v238_v36  ;;  %1971 = vmatmul.mubr.msk.f32.vlgmr.msra.gmra.mxu0 %vm109_vm1, %v238_v36 }
 0x20b   :  { %586 = vmatpush1.msra.mxu1 %v2300_v3  ;;  %470 = vmatpush1.msra.mxu0 %v2433_v44 }
 0x20c   :  { %587 = vmatprep.subr.mxu1 %v2305_v4  ;;  %471 = vmatprep.subr.mxu0 %v2435_v45 }
 0x20d   :  { %588 = vmatpush1.msra.mxu1 %v2311_v5  ;;  %472 = vmatpush1.msra.mxu0 %v2438_v46 }
 0x20e   :  { %589 = vmatprep.subr.mxu1 %v2318_v6  ;;  %473 = vmatprep.subr.mxu0 %v2442_v47 }
 0x20f   :  { %590 = vmatpush1.msra.mxu1 %v2325_v7  ;;  %474 = vmatpush1.msra.mxu0 %v2445_v48 }
 0x210   :  { %591 = vmatprep.subr.mxu1 %v2332_v8  ;;  %475 = vmatprep.subr.mxu0 %v2448_v49 }
 0x211   :  { %592 = vmatpush1.msra.mxu1 %v2339_v9  ;;  %476 = vmatpush1.msra.mxu0 %v2451_v50 }
 0x212   :  { %593 = vmatprep.subr.mxu1 %v2346_v10  ;;  %477 = vmatprep.subr.mxu0 %v2454_v51 }
 0x213   :  { %594 = vmatpush1.msra.mxu1 %v2353_v11  ;;  %633 = vmatprep.mubr.f32.mxu1 %v3208_v1 }
 0x214   :  { %595 = vmatprep.subr.mxu1 %v2360_v12  ;;  %478 = vmatpush1.msra.mxu0 %v2457_v52 }
 0x215   :  { %596 = vmatpush1.msra.mxu1 %v2367_v13  ;;  %479 = vmatprep.subr.mxu0 %v2460_v53 }
 0x216   :  { %597 = vmatprep.subr.mxu1 %v2374_v14  ;;  %480 = vmatpush1.msra.mxu0 %v2463_v54 }
 0x217   :  { %598 = vmatpush1.msra.mxu1 %v2381_v15  ;;  %481 = vmatprep.subr.mxu0 %v2466_v55 }
 0x218   :  { %599 = vmatprep.subr.mxu1 %v2388_v16  ;;  %482 = vmatpush1.msra.mxu0 %v2469_v56 }
 0x219   :  { %600 = vmatpush1.msra.mxu1 %v2395_v17  ;;  %483 = vmatprep.subr.mxu0 %v2472_v57 }
 0x21a   :  { %484 = vmatpush1.msra.mxu0 %v2475_v58  ;;  %533 = vmatprep.mubr.f32.mxu0 %v3208_v1 }
 0x21b   :  { %485 = vmatprep.subr.mxu0 %v2478_v59  ;;  %697 = vmatprep.subr.mxu1 %v2431_v43 }
 0x21c   :  { %486 = vmatpush1.msra.mxu0 %v2481_v60 }
 0x21d   :  { %487 = vmatprep.subr.mxu0 %v2484_v61 }
 0x21e   :  { %488 = vmatpush1.msra.mxu0 %v2487_v62 }
 0x21f   :  { %489 = vmatprep.subr.mxu0 %v2490_v63 }
 0x220   :  { %490 = vmatpush1.msra.mxu0 %v2493_v0 }
 0x221   :  { %491 = vmatprep.subr.mxu0 %v2496_v18 }
 0x222   :  { %492 = vmatpush1.msra.mxu0 %v2499_v19 }
 0x223   :  { %493 = vmatprep.subr.mxu0 %v2502_v20 }
 0x224   :  { %494 = vmatpush1.msra.mxu0 %v2505_v22 }
 0x225   :  { %495 = vmatprep.subr.mxu0 %v2508_v23 }
 0x226   :  { %496 = vmatpush1.msra.mxu0 %v2511_v25 }
 0x227   :  { %497 = vmatprep.subr.mxu0 %v2514_v26 }
 0x228   :  { %498 = vmatpush1.msra.mxu0 %v2517_v27 }
 0x229   :  { %499 = vmatprep.subr.mxu0 %v2520_v28 }
 0x22a   :  { %500 = vmatpush1.msra.mxu0 %v2523_v29 }
 0x22b   :  { %813 = vmatprep.subr.mxu0 %v2295_v2 }
 0x2ca   :  { %v407_v37 = vpop.f32.mrf.mxu0 }
 0x2cc   :  { %v409_v38 = vpop.f32.mrf.mxu0 }
 0x2cd   :  { %v414_v39 = vcombine.low %v407_v37, %v409_v38 }
 0x2cf   :  { %v421_v41 = vrot.slane %v414_v39, %v2409_v24  ;;  %v95_v39 = vsub.s32 1, %v2406_v21 }
 0x2d1   :  { %v423_v42 = vadd.f32 %v1970_v40, %v421_v41  ;;  %v307_v40 = vpop.f32.mrf.mxu1  ;;  %v87_v41 = vld [vmem:[%s3204_s3] sm:$0x3] }
 0x2d3   :  { %v1972_v30 = vmul.f32 -1.442695, %v423_v42 }
 0x2d5   :  { %2021 = vpow2.f32 %v1972_v30  ;;  %v91_v30 = vsub.s32 0, %v2406_v21 }
 0x2d6   :  { %2023 = vtanh.f32 %v423_v42  ;;  %v2600_v42 = vrot.slane %v87_v41, %v95_v39 }
 0x2e2   :  { %v2022_v31 = vpop.eup %2021 }
 0x2e3   :  { %v428_v33 = vadd.f32 1.0, %v2022_v31  ;;  %v2024_v34 = vpop.eup %2023 }
 0x2e4   :  { %v438_v36 = vrot.slane %v2024_v34, %v2409_v24 }
 0x2e5   :  { %2025 = vrcp.f32 %v428_v33  ;;  %v2604_v33 = vrot.slane %v87_v41, %v91_v30 }
 0x2e6   :  { %v439_v37 = vcombine.high %v438_v36, %v438_v36 }
 0x2e7   :  { %v308_v36 = vadd.f32 %v307_v40, %v2604_v33 }
 0x2f2   :  { %v2026_v1 = vpop.eup %2025 }
 0x2f3   :  { %v449_v43 = vrot.slane %v2026_v1, %v2409_v24  ;;  %v309_v1 = vpop.f32.mrf.mxu1 }
 0x2f4   :  { %v310_v31 = vadd.f32 %v309_v1, %v2600_v42 }
 0x2f5   :  { %v450_v38 = vcombine.high %v449_v43, %v449_v43  ;;  %v455_v24 = vmul.f32 %v449_v43, %v2530_v32 }
 0x2f6   :  { %v1969_v34 = vmul.f32 -1.442695, %v310_v31 }
 0x2f7   :  { %v454_v17 = vsel %vm105_vm0, %v439_v37, %v450_v38 }
 0x2f8   :  { %v456_v16 = vmul.f32 %v454_v17, %v449_v43  ;;  %2027 = vpow2.f32 %v1969_v34 }
 0x2fa   :  { %458 = vrot.lane.b32.xlu1 %v456_v16, %s2248_s12  ;;  %v1968_v16 = vmul.f32 -1.442695, %v308_v36 }
 0x2fc   :  { %2029 = vpow2.f32 %v1968_v16 }
 0x305   :  { %v2028_v37 = vpop.eup %2027 }
 0x306   :  { %v321_v38 = vadd.f32 1.0, %v2028_v37 }
 0x308   :  { %2031 = vrcp.f32 %v321_v38 }
 0x309   :  { %v2030_v15 = vpop.eup %2029 }
 0x30a   :  { %v320_v21 = vadd.f32 1.0, %v2030_v15  ;;  %v3250_v15 = vmov 0.0  }
 0x315   :  { %v2032_v41 = vpop.eup %2031 }
 0x36c   :  { %v459_v39 = vpop.permute.xlu1 %458 }
 0x36d   :  { %v2608_v14 = vadd.f32 %v459_v39, %v455_v24  ;;  %v3251_v39 = vld [vmem:[#allocation7_spill] sm:$0xff] }
 0x36f   :  { %2033 = vtanh.f32 %v2608_v14 }
 0x370   :  { %2035 = vtanh.f32 %v310_v31 }
 0x371   :  { %2037 = vrcp.f32 %v320_v21  ;;  %v3252_v21 = vld [vmem:[#allocation8_spill] sm:$0xff] }
 0x37c   :  { %v2034_v30 = vpop.eup %2033 }
 0x37d   :  { %v2036_v40 = vpop.eup %2035  ;;  %v463_v1 = vmul.f32 %v2034_v30, %v454_v17  ;;  %v3254_v30 = vld [vmem:[#allocation10_spill] sm:$0xff] }
 0x37e   :  { %v327_v34 = vsel %vm105_vm0, %v2036_v40, %v2032_v41  ;;  %v2038_v43 = vpop.eup %2037  ;;  %v3253_v41 = vld [vmem:[#allocation9_spill] sm:$0xff]  ;;  %v3255_v40 = vld [vmem:[#allocation12_spill] sm:$0xff] }
 0x37f   :  { %465 = vrot.lane.b32.xlu1 %v463_v1, %s2248_s12  ;;  %v329_v32 = vmul.f32 %v2038_v43, %v327_v34  ;;  %v328_v31 = vmul.f32 0.0, %v2038_v43 }
 0x383   :  { %331 = vrot.lane.b32.xlu1 %v329_v32, %s2248_s12  ;;  %v1975_v32 = vld [vmem:[%s3201_s0 + $0x8] sm:$0xf] }
 0x3f1   :  { %v466_v24 = vpop.permute.xlu1 %465 }
 0x3f2   :  { %1976 = vmatmul.mubr.msk.f32.vlgmr.msra.gmra.mxu1 %vm109_vm1, %v466_v24 }
 0x3f3   :  { %698 = vmatpush1.msra.mxu1 %v2433_v44  ;;  %761 = vmatprep.mubr.f32.mxu1 %v3250_v15 }
 0x3f4   :  { %699 = vmatprep.subr.mxu1 %v2435_v45 }
 0x3f5   :  { %v332_v17 = vpop.permute.xlu1 %331  ;;  %700 = vmatpush1.msra.mxu1 %v2438_v46 }
 0x3f6   :  { %v2620_v36 = vadd.f32 %v332_v17, %v328_v31  ;;  %701 = vmatprep.subr.mxu1 %v2442_v47 }
 0x3f7   :  { %702 = vmatpush1.msra.mxu1 %v2445_v48 }
 0x3f8   :  { %2039 = vtanh.f32 %v2620_v36  ;;  %703 = vmatprep.subr.mxu1 %v2448_v49 }
 0x3f9   :  { %704 = vmatpush1.msra.mxu1 %v2451_v50 }
 0x3fa   :  { %705 = vmatprep.subr.mxu1 %v2454_v51 }
 0x3fb   :  { %706 = vmatpush1.msra.mxu1 %v2457_v52 }
 0x3fc   :  { %707 = vmatprep.subr.mxu1 %v2460_v53 }
 0x3fd   :  { %708 = vmatpush1.msra.mxu1 %v2463_v54 }
 0x3fe   :  { %709 = vmatprep.subr.mxu1 %v2466_v55 }
 0x3ff   :  { %710 = vmatpush1.msra.mxu1 %v2469_v56 }
 0x400   :  { %711 = vmatprep.subr.mxu1 %v2472_v57 }
 0x401   :  { %712 = vmatpush1.msra.mxu1 %v2475_v58 }
 0x402   :  { %713 = vmatprep.subr.mxu1 %v2478_v59 }
 0x403   :  { %714 = vmatpush1.msra.mxu1 %v2481_v60 }
 0x404   :  { %715 = vmatprep.subr.mxu1 %v2484_v61 }
 0x405   :  { %v2040_v16 = vpop.eup %2039  ;;  %716 = vmatpush1.msra.mxu1 %v2487_v62 }
 0x406   :  { %v336_v37 = vmul.f32 %v2040_v16, %v327_v34  ;;  %717 = vmatprep.subr.mxu1 %v2490_v63 }
 0x407   :  { %718 = vmatpush1.msra.mxu1 %v2493_v0 }
 0x408   :  { %v468_v38 = vsel %vm109_vm1, %v466_v24, %v336_v37  ;;  %719 = vmatprep.subr.mxu1 %v2496_v18  ;;  %v3256_v24 = vld [vmem:[#allocation11_spill] sm:$0xff] }
 0x409   :  { %534 = vmatmul.mubr.f32.vlgmr.msra.gmra.mxu0 %v468_v38  ;;  %720 = vmatpush1.msra.mxu1 %v2499_v19 }
 0x40a   :  { %814 = vmatpush1.msra.mxu0 %v2300_v3  ;;  %861 = vmatprep.mubr.f32.mxu0 %v3250_v15 }
 0x40b   :  { %815 = vmatprep.subr.mxu0 %v2305_v4  ;;  %721 = vmatprep.subr.mxu1 %v2502_v20 }
 0x40c   :  { %816 = vmatpush1.msra.mxu0 %v2311_v5  ;;  %722 = vmatpush1.msra.mxu1 %v2505_v22 }
 0x40d   :  { %817 = vmatprep.subr.mxu0 %v2318_v6  ;;  %723 = vmatprep.subr.mxu1 %v2508_v23 }
 0x40e   :  { %818 = vmatpush1.msra.mxu0 %v2325_v7  ;;  %724 = vmatpush1.msra.mxu1 %v2511_v25 }
 0x40f   :  { %819 = vmatprep.subr.mxu0 %v2332_v8  ;;  %725 = vmatprep.subr.mxu1 %v2514_v26 }
 0x410   :  { %820 = vmatpush1.msra.mxu0 %v2339_v9  ;;  %726 = vmatpush1.msra.mxu1 %v2517_v27 }
 0x411   :  { %821 = vmatprep.subr.mxu0 %v2346_v10  ;;  %727 = vmatprep.subr.mxu1 %v2520_v28 }
 0x412   :  { %822 = vmatpush1.msra.mxu0 %v2353_v11  ;;  %728 = vmatpush1.msra.mxu1 %v2523_v29 }
 0x413   :  { %823 = vmatprep.subr.mxu0 %v2360_v12  ;;  %1041 = vmatprep.subr.mxu1 %v2295_v2 }
 0x414   :  { %824 = vmatpush1.msra.mxu0 %v2367_v13 }
 0x415   :  { %825 = vmatprep.subr.mxu0 %v3251_v39 }
 0x416   :  { %826 = vmatpush1.msra.mxu0 %v3252_v21 }
 0x417   :  { %827 = vmatprep.subr.mxu0 %v3253_v41 }
 0x418   :  { %828 = vmatpush1.msra.mxu0 %v3254_v30 }
 0x419   :  { %925 = vmatprep.subr.mxu0 %v3255_v40 }
 0x4b2   :  { %v635_v1 = vpop.f32.mrf.mxu1 }
 0x4b4   :  { %v637_v34 = vpop.f32.mrf.mxu1 }
 0x4b5   :  { %v642_v43 = vcombine.low %v635_v1, %v637_v34 }
 0x4b7   :  { %v649_v31 = vrot.slane %v642_v43, %v3256_v24 }
 0x4b9   :  { %v651_v17 = vadd.f32 %v1975_v32, %v649_v31 }
 0x4bb   :  { %v1977_v16 = vmul.f32 -1.442695, %v651_v17 }
 0x4bd   :  { %2041 = vpow2.f32 %v1977_v16 }
 0x4be   :  { %2043 = vtanh.f32 %v651_v17 }
 0x4c9   :  { %v535_v43 = vpop.f32.mrf.mxu0 }
 0x4ca   :  { %v2042_v37 = vpop.eup %2041  ;;  %v536_v16 = vadd.f32 %v535_v43, %v2604_v33 }
 0x4cb   :  { %v656_v38 = vadd.f32 1.0, %v2042_v37  ;;  %v2044_v41 = vpop.eup %2043  ;;  %v537_v32 = vpop.f32.mrf.mxu0 }
 0x4cc   :  { %v666_v30 = vrot.slane %v2044_v41, %v3256_v24  ;;  %v538_v31 = vadd.f32 %v537_v32, %v2600_v42  ;;  %v1973_v41 = vmul.f32 -1.442695, %v536_v16 }
 0x4cd   :  { %2045 = vrcp.f32 %v656_v38 }
 0x4ce   :  { %v667_v1 = vcombine.high %v666_v30, %v666_v30  ;;  %v1974_v17 = vmul.f32 -1.442695, %v538_v31 }
 0x4d0   :  { %2047 = vpow2.f32 %v1974_v17 }
 0x4d1   :  { %2049 = vpow2.f32 %v1973_v41 }
 0x4da   :  { %v2046_v40 = vpop.eup %2045 }
 0x4db   :  { %v677_v21 = vrot.slane %v2046_v40, %v3256_v24 }
 0x4dd   :  { %v678_v34 = vcombine.high %v677_v21, %v677_v21  ;;  %v2048_v37 = vpop.eup %2047  ;;  %v683_v30 = vmul.f32 %v677_v21, %v2608_v14 }
 0x4de   :  { %v549_v40 = vadd.f32 1.0, %v2048_v37  ;;  %v2050_v38 = vpop.eup %2049 }
 0x4df   :  { %v682_v39 = vsel %vm105_vm0, %v667_v1, %v678_v34 }
 0x4e0   :  { %v684_v13 = vmul.f32 %v682_v39, %v677_v21  ;;  %2051 = vrcp.f32 %v549_v40 }
 0x4e2   :  { %686 = vrot.lane.b32.xlu0 %v684_v13, %s2248_s12  ;;  %v548_v13 = vadd.f32 1.0, %v2050_v38  ;;  %v3258_v38 = vld [vmem:[#allocation7_spill] sm:$0xff] }
 0x4ed   :  { %v2052_v34 = vpop.eup %2051 }
 0x554   :  { %v687_v24 = vpop.permute.xlu0 %686 }
 0x555   :  { %v2682_v1 = vadd.f32 %v687_v24, %v683_v30  ;;  %v3257_v30 = vld [vmem:[#allocation6_spill] sm:$0xff] }
 0x557   :  { %2053 = vtanh.f32 %v2682_v1 }
 0x558   :  { %2055 = vtanh.f32 %v538_v31 }
 0x559   :  { %2057 = vrcp.f32 %v548_v13  ;;  %v3259_v13 = vld [vmem:[#allocation8_spill] sm:$0xff] }
 0x564   :  { %v2054_v32 = vpop.eup %2053 }
 0x565   :  { %v2056_v43 = vpop.eup %2055  ;;  %v691_v17 = vmul.f32 %v2054_v32, %v682_v39  ;;  %v3261_v32 = vld [vmem:[#allocation10_spill] sm:$0xff] }
 0x566   :  { %v555_v16 = vsel %vm105_vm0, %v2056_v43, %v2052_v34  ;;  %v2058_v14 = vpop.eup %2057  ;;  %v3260_v34 = vld [vmem:[#allocation9_spill] sm:$0xff]  ;;  %v3262_v43 = vld [vmem:[#allocation12_spill] sm:$0xff] }
 0x567   :  { %693 = vrot.lane.b32.xlu0 %v691_v17, %s2248_s12  ;;  %v557_v21 = vmul.f32 %v2058_v14, %v555_v16  ;;  %v556_v31 = vmul.f32 %v2058_v14, %v2620_v36 }
 0x56b   :  { %559 = vrot.lane.b32.xlu0 %v557_v21, %s2248_s12  ;;  %v1980_v21 = vld [vmem:[%s3201_s0 + $0xc] sm:$0xf] }
 0x5d9   :  { %v694_v24 = vpop.permute.xlu0 %693 }
 0x5da   :  { %1981 = vmatmul.mubr.msk.f32.vlgmr.msra.gmra.mxu0 %vm109_vm1, %v694_v24 }
 0x5db   :  { %926 = vmatpush1.msra.mxu0 %v2433_v44  ;;  %989 = vmatprep.mubr.f32.mxu0 %v3250_v15 }
 0x5dc   :  { %927 = vmatprep.subr.mxu0 %v2435_v45 }
 0x5dd   :  { %v560_v39 = vpop.permute.xlu0 %559  ;;  %928 = vmatpush1.msra.mxu0 %v2438_v46 }
 0x5de   :  { %v2695_v41 = vadd.f32 %v560_v39, %v556_v31  ;;  %929 = vmatprep.subr.mxu0 %v2442_v47 }
 0x5df   :  { %930 = vmatpush1.msra.mxu0 %v2445_v48 }
 0x5e0   :  { %2059 = vtanh.f32 %v2695_v41  ;;  %931 = vmatprep.subr.mxu0 %v2448_v49 }
 0x5e1   :  { %932 = vmatpush1.msra.mxu0 %v2451_v50 }
 0x5e2   :  { %933 = vmatprep.subr.mxu0 %v2454_v51 }
 0x5e3   :  { %934 = vmatpush1.msra.mxu0 %v2457_v52 }
 0x5e4   :  { %935 = vmatprep.subr.mxu0 %v2460_v53 }
 0x5e5   :  { %936 = vmatpush1.msra.mxu0 %v2463_v54 }
 0x5e6   :  { %937 = vmatprep.subr.mxu0 %v2466_v55 }
 0x5e7   :  { %938 = vmatpush1.msra.mxu0 %v2469_v56 }
 0x5e8   :  { %939 = vmatprep.subr.mxu0 %v2472_v57 }
 0x5e9   :  { %940 = vmatpush1.msra.mxu0 %v2475_v58 }
 0x5ea   :  { %941 = vmatprep.subr.mxu0 %v2478_v59 }
 0x5eb   :  { %942 = vmatpush1.msra.mxu0 %v2481_v60 }
 0x5ec   :  { %943 = vmatprep.subr.mxu0 %v2484_v61 }
 0x5ed   :  { %v2060_v36 = vpop.eup %2059  ;;  %944 = vmatpush1.msra.mxu0 %v2487_v62 }
 0x5ee   :  { %v564_v37 = vmul.f32 %v2060_v36, %v555_v16  ;;  %945 = vmatprep.subr.mxu0 %v2490_v63 }
 0x5ef   :  { %946 = vmatpush1.msra.mxu0 %v2493_v0 }
 0x5f0   :  { %v696_v40 = vsel %vm109_vm1, %v694_v24, %v564_v37  ;;  %947 = vmatprep.subr.mxu0 %v2496_v18 }
 0x5f1   :  { %762 = vmatmul.mubr.f32.vlgmr.msra.gmra.mxu1 %v696_v40  ;;  %948 = vmatpush1.msra.mxu0 %v2499_v19 }
 0x5f2   :  { %1042 = vmatpush1.msra.mxu1 %v2300_v3  ;;  %949 = vmatprep.subr.mxu0 %v2502_v20 }
 0x5f3   :  { %1043 = vmatprep.subr.mxu1 %v2305_v4  ;;  %950 = vmatpush1.msra.mxu0 %v2505_v22 }
 0x5f4   :  { %1044 = vmatpush1.msra.mxu1 %v2311_v5  ;;  %951 = vmatprep.subr.mxu0 %v2508_v23 }
 0x5f5   :  { %1045 = vmatprep.subr.mxu1 %v2318_v6  ;;  %952 = vmatpush1.msra.mxu0 %v2511_v25 }
 0x5f6   :  { %1046 = vmatpush1.msra.mxu1 %v2325_v7  ;;  %953 = vmatprep.subr.mxu0 %v2514_v26 }
 0x5f7   :  { %1047 = vmatprep.subr.mxu1 %v2332_v8  ;;  %954 = vmatpush1.msra.mxu0 %v2517_v27 }
 0x5f8   :  { %1048 = vmatpush1.msra.mxu1 %v2339_v9  ;;  %955 = vmatprep.subr.mxu0 %v2520_v28 }
 0x5f9   :  { %1049 = vmatprep.subr.mxu1 %v2346_v10  ;;  %1089 = vmatprep.mubr.f32.mxu1 %v3250_v15 }
 0x5fa   :  { %1050 = vmatpush1.msra.mxu1 %v2353_v11  ;;  %956 = vmatpush1.msra.mxu0 %v2523_v29 }
 0x5fb   :  { %1051 = vmatprep.subr.mxu1 %v2360_v12  ;;  %1269 = vmatprep.subr.mxu0 %v2295_v2  ;;  %v3263_v2 = vld [vmem:[#allocation11_spill] sm:$0xff] }
 0x5fc   :  { %1052 = vmatpush1.msra.mxu1 %v3257_v30 }
 0x5fd   :  { %1053 = vmatprep.subr.mxu1 %v3258_v38 }
 0x5fe   :  { %1054 = vmatpush1.msra.mxu1 %v3259_v13 }
 0x5ff   :  { %1055 = vmatprep.subr.mxu1 %v3260_v34 }
 0x600   :  { %1056 = vmatpush1.msra.mxu1 %v3261_v32 }
 0x601   :  { %1153 = vmatprep.subr.mxu1 %v3262_v43 }
 0x69a   :  { %v863_v17 = vpop.f32.mrf.mxu0 }
 0x69c   :  { %v865_v16 = vpop.f32.mrf.mxu0 }
 0x69d   :  { %v870_v14 = vcombine.low %v863_v17, %v865_v16 }
 0x69f   :  { %v877_v24 = vrot.slane %v870_v14, %v3263_v2 }
 0x6a1   :  { %v879_v31 = vadd.f32 %v1980_v21, %v877_v24 }
 0x6a3   :  { %v1982_v39 = vmul.f32 -1.442695, %v879_v31 }
 0x6a5   :  { %2061 = vpow2.f32 %v1982_v39 }
 0x6a6   :  { %2063 = vtanh.f32 %v879_v31 }
 0x6b1   :  { %v763_v36 = vpop.f32.mrf.mxu1 }
 0x6b2   :  { %v2062_v37 = vpop.eup %2061  ;;  %v764_v40 = vadd.f32 %v763_v36, %v2604_v33 }
 0x6b3   :  { %v884_v29 = vadd.f32 1.0, %v2062_v37  ;;  %v765_v28 = vpop.f32.mrf.mxu1  ;;  %v2064_v16 = vpop.eup %2063 }
 0x6b4   :  { %v1978_v27 = vmul.f32 -1.442695, %v764_v40  ;;  %v766_v26 = vadd.f32 %v765_v28, %v2600_v42  ;;  %v894_v14 = vrot.slane %v2064_v16, %v3263_v2 }
 0x6b5   :  { %2065 = vrcp.f32 %v884_v29 }
 0x6b6   :  { %2067 = vpow2.f32 %v1978_v27  ;;  %v1979_v17 = vmul.f32 -1.442695, %v766_v26  ;;  %v895_v23 = vcombine.high %v894_v14, %v894_v14 }
 0x6b8   :  { %2069 = vpow2.f32 %v1979_v17 }
 0x6b9   :  { %2071 = vtanh.f32 %v766_v26 }
 0x6c2   :  { %v2066_v21 = vpop.eup %2065 }
 0x6c3   :  { %v2068_v24 = vpop.eup %2067  ;;  %v905_v31 = vrot.slane %v2066_v21, %v3263_v2 }
 0x6c4   :  { %v776_v25 = vadd.f32 1.0, %v2068_v24 }
 0x6c5   :  { %v2070_v39 = vpop.eup %2069  ;;  %v906_v36 = vcombine.high %v905_v31, %v905_v31  ;;  %v911_v14 = vmul.f32 %v905_v31, %v2682_v1 }
 0x6c6   :  { %v777_v37 = vadd.f32 1.0, %v2070_v39  ;;  %v2072_v29 = vpop.eup %2071 }
 0x6c7   :  { %v910_v28 = vsel %vm105_vm0, %v895_v23, %v906_v36 }
 0x6c8   :  { %2073 = vrcp.f32 %v777_v37  ;;  %v912_v27 = vmul.f32 %v910_v28, %v905_v31 }
 0x6c9   :  { %2075 = vrcp.f32 %v776_v25 }
 0x6ca   :  { %914 = vrot.lane.b32.xlu1 %v912_v27, %s2248_s12 }
 0x6d5   :  { %v2074_v40 = vpop.eup %2073 }
 0x6d6   :  { %v2076_v17 = vpop.eup %2075  ;;  %v783_v16 = vsel %vm105_vm0, %v2072_v29, %v2074_v40 }
 0x6d7   :  { %v785_v21 = vmul.f32 %v2076_v17, %v783_v16  ;;  %v784_v36 = vmul.f32 %v2076_v17, %v2695_v41 }
 0x6d9   :  { %787 = vrot.lane.b32.xlu0 %v785_v21, %s2248_s12 }
 0x73c   :  { %v915_v26 = vpop.permute.xlu1 %914 }
 0x73d   :  { %v2760_v24 = vadd.f32 %v915_v26, %v911_v14 }
 0x73f   :  { %2077 = vtanh.f32 %v2760_v24 }
 0x74b   :  { %v788_v39 = vpop.permute.xlu0 %787 }
 0x74c   :  { %v2078_v23 = vpop.eup %2077  ;;  %v2765_v37 = vadd.f32 %v788_v39, %v784_v36  ;;  %v2850_v39 = vld [vmem:[#allocation3 + $0xf0] sm:$0xff]  ;;  %v2853_v36 = vld [vmem:[#allocation3 + $0xe8] sm:$0xff] }
 0x74d   :  { %v919_v25 = vmul.f32 %v2078_v23, %v910_v28 }
 0x74e   :  { %2079 = vtanh.f32 %v2765_v37 }
 0x74f   :  { %921 = vrot.lane.b32.xlu1 %v919_v25, %s2248_s12 }
 0x75b   :  { %v2080_v27 = vpop.eup %2079 }
 0x75c   :  { %v792_v29 = vmul.f32 %v2080_v27, %v783_v16  ;;  %v2862_v27 = vld [vmem:[#allocation3 + $0xe0] sm:$0xff] }
 0x7c1   :  { %v922_v40 = vpop.permute.xlu1 %921 }
 0x7c2   :  { %v924_v1 = vsel %vm109_vm1, %v922_v40, %v792_v29  ;;  %1986 = vmatmul.mubr.msk.f32.vlgmr.msra.gmra.mxu1 %vm109_vm1, %v922_v40  ;;  %v2868_v29 = vld [vmem:[%s3202_s1 + $0x68] sm:$0xff]  ;;  %v2871_v40 = vld [vmem:[#allocation3 + $0xd8] sm:$0xff] }
 0x7c3   :  { %990 = vmatmul.mubr.f32.vlgmr.msra.gmra.mxu0 %v924_v1  ;;  %1154 = vmatpush1.msra.mxu1 %v2433_v44  ;;  %v2877_v1 = vld [vmem:[%s3202_s1 + $0x60] sm:$0xff] }
 0x7c4   :  { %1155 = vmatprep.subr.mxu1 %v2435_v45  ;;  %1270 = vmatpush1.msra.mxu0 %v2300_v3  ;;  %v3264_v3 = vld [vmem:[#allocation13_spill] sm:$0xff] }
 0x7c5   :  { %1156 = vmatpush1.msra.mxu1 %v2438_v46  ;;  %1271 = vmatprep.subr.mxu0 %v2305_v4  ;;  %v3265_v4 = vld [vmem:[#allocation14_spill] sm:$0xff]  ;;  %v1985_v46 = vld [vmem:[%s3201_s0 + $0x10] sm:$0xf] }
 0x7c6   :  { %1157 = vmatprep.subr.mxu1 %v2442_v47  ;;  %1272 = vmatpush1.msra.mxu0 %v2311_v5  ;;  %v3266_v5 = vld [vmem:[#allocation15_spill] sm:$0xff] }
 0x7c7   :  { %1158 = vmatpush1.msra.mxu1 %v2445_v48  ;;  %1273 = vmatprep.subr.mxu0 %v2318_v6  ;;  %v3267_v6 = vld [vmem:[#allocation16_spill] sm:$0xff] }
 0x7c8   :  { %1159 = vmatprep.subr.mxu1 %v2448_v49  ;;  %1274 = vmatpush1.msra.mxu0 %v2325_v7  ;;  %v3268_v7 = vld [vmem:[#allocation17_spill] sm:$0xff] }
 0x7c9   :  { %1160 = vmatpush1.msra.mxu1 %v2451_v50  ;;  %1275 = vmatprep.subr.mxu0 %v2332_v8  ;;  %v3269_v8 = vld [vmem:[#allocation18_spill] sm:$0xff] }
 0x7ca   :  { %1161 = vmatprep.subr.mxu1 %v2454_v51  ;;  %1276 = vmatpush1.msra.mxu0 %v2339_v9  ;;  %v2822_v9 = vld [vmem:[%s3202_s1 + $0x78] sm:$0xff] }
 0x7cb   :  { %1162 = vmatpush1.msra.mxu1 %v2457_v52  ;;  %1277 = vmatprep.subr.mxu0 %v2346_v10 }
 0x7cc   :  { %1163 = vmatprep.subr.mxu1 %v2460_v53  ;;  %1278 = vmatpush1.msra.mxu0 %v2353_v11 }
 0x7cd   :  { %1164 = vmatpush1.msra.mxu1 %v2463_v54  ;;  %1279 = vmatprep.subr.mxu0 %v2360_v12 }
 0x7ce   :  { %1165 = vmatprep.subr.mxu1 %v2466_v55  ;;  %1280 = vmatpush1.msra.mxu0 %v3257_v30 }
 0x7cf   :  { %1166 = vmatpush1.msra.mxu1 %v2469_v56  ;;  %1281 = vmatprep.subr.mxu0 %v3258_v38 }
 0x7d0   :  { %1167 = vmatprep.subr.mxu1 %v2472_v57  ;;  %1282 = vmatpush1.msra.mxu0 %v3259_v13 }
 0x7d1   :  { %1168 = vmatpush1.msra.mxu1 %v2475_v58  ;;  %1283 = vmatprep.subr.mxu0 %v3260_v34 }
 0x7d2   :  { %1169 = vmatprep.subr.mxu1 %v2478_v59  ;;  %1284 = vmatpush1.msra.mxu0 %v3261_v32 }
 0x7d3   :  { %1170 = vmatpush1.msra.mxu1 %v2481_v60  ;;  %1317 = vmatprep.mubr.f32.mxu0 %v3250_v15 }
 0x7d4   :  { %1171 = vmatprep.subr.mxu1 %v2484_v61  ;;  %1217 = vmatprep.mubr.f32.mxu1 %v3250_v15 }
 0x7d5   :  { %1172 = vmatpush1.msra.mxu1 %v2487_v62  ;;  %1381 = vmatprep.subr.mxu0 %v3262_v43 }
 0x7d6   :  { %1173 = vmatprep.subr.mxu1 %v2490_v63 }
 0x7d7   :  { %1174 = vmatpush1.msra.mxu1 %v2493_v0 }
 0x7d8   :  { %1175 = vmatprep.subr.mxu1 %v2496_v18 }
 0x7d9   :  { %1176 = vmatpush1.msra.mxu1 %v2499_v19 }
 0x7da   :  { %1177 = vmatprep.subr.mxu1 %v2502_v20 }
 0x7db   :  { %1178 = vmatpush1.msra.mxu1 %v2505_v22 }
 0x7dc   :  { %1179 = vmatprep.subr.mxu1 %v3264_v3 }
 0x7dd   :  { %1180 = vmatpush1.msra.mxu1 %v3265_v4 }
 0x7de   :  { %1181 = vmatprep.subr.mxu1 %v3266_v5 }
 0x7df   :  { %1182 = vmatpush1.msra.mxu1 %v3267_v6 }
 0x7e0   :  { %1183 = vmatprep.subr.mxu1 %v3268_v7 }
 0x7e1   :  { %1184 = vmatpush1.msra.mxu1 %v3269_v8 }
 0x7e2   :  { %1497 = vmatprep.subr.mxu1 %v2822_v9 }
 0x882   :  { %v1091_v10 = vpop.f32.mrf.mxu1 }
 0x883   :  { %v991_v11 = vpop.f32.mrf.mxu0 }
 0x884   :  { %v1093_v12 = vpop.f32.mrf.mxu1  ;;  %v992_v51 = vadd.f32 %v991_v11, %v2604_v33  ;;  %v2886_v11 = vld [vmem:[%s3202_s1 + $0x58] sm:$0xff] }
 0x885   :  { %v1098_v44 = vcombine.low %v1091_v10, %v1093_v12  ;;  %v993_v45 = vpop.f32.mrf.mxu0  ;;  %v2880_v10 = vld [vmem:[#allocation3 + $0xd0] sm:$0xff]  ;;  %v2889_v12 = vld [vmem:[#allocation3 + $0xc8] sm:$0xff] }
 0x886   :  { %v994_v47 = vadd.f32 %v993_v45, %v2600_v42  ;;  %v1983_v53 = vmul.f32 -1.442695, %v992_v51  ;;  %v2898_v45 = vld [vmem:[#allocation3 + $0xc0] sm:$0xff]  ;;  %v2925_v51 = vld [vmem:[#allocation3 + $0xa8] sm:$0xff] }
 0x887   :  { %v1105_v48 = vrot.slane %v1098_v44, %v3263_v2  ;;  %v2895_v44 = vld [vmem:[%s3202_s1 + $0x50] sm:$0xff] }
 0x888   :  { %v1984_v49 = vmul.f32 -1.442695, %v994_v47 }
 0x889   :  { %v1107_v50 = vadd.f32 %v1985_v46, %v1105_v48  ;;  %v2904_v46 = vld [vmem:[%s3202_s1 + $0x48] sm:$0xff]  ;;  %v2913_v48 = vld [vmem:[%s3202_s1 + $0x40] sm:$0xff] }
 0x88a   :  { %2081 = vpow2.f32 %v1984_v49  ;;  %v2916_v49 = vld [vmem:[#allocation3 + $0xb0] sm:$0xff] }
 0x88b   :  { %v1987_v52 = vmul.f32 -1.442695, %v1107_v50 }
 0x88d   :  { %2083 = vpow2.f32 %v1987_v52  ;;  %v2931_v52 = vld [vmem:[%s3202_s1 + $0x30] sm:$0xff] }
 0x88e   :  { %2085 = vpow2.f32 %v1983_v53  ;;  %v2934_v53 = vld [vmem:[#allocation3 + $0xa0] sm:$0xff] }
 0x88f   :  { %2087 = vtanh.f32 %v1107_v50  ;;  %v2922_v50 = vld [vmem:[%s3202_s1 + $0x38] sm:$0xff] }
 0x897   :  { %v2082_v54 = vpop.eup %2081 }
 0x898   :  { %v1005_v57 = vadd.f32 1.0, %v2082_v54  ;;  %v2940_v54 = vld [vmem:[%s3202_s1 + $0x28] sm:$0xff] }
 0x89a   :  { %v2084_v55 = vpop.eup %2083 }
 0x89b   :  { %v1112_v56 = vadd.f32 1.0, %v2084_v55  ;;  %v2086_v58 = vpop.eup %2085  ;;  %v2943_v55 = vld [vmem:[#allocation3 + $0x98] sm:$0xff] }
 0x89c   :  { %v1004_v59 = vadd.f32 1.0, %v2086_v58  ;;  %v2088_v60 = vpop.eup %2087  ;;  %v2958_v58 = vld [vmem:[%s3202_s1 + $0x18] sm:$0xff] }
 0x89d   :  { %2089 = vrcp.f32 %v1112_v56  ;;  %v1122_v61 = vrot.slane %v2088_v60, %v3263_v2  ;;  %v2949_v56 = vld [vmem:[%s3202_s1 + $0x20] sm:$0xff]  ;;  %v2967_v60 = vld [vmem:[%s3202_s1 + $0x10] sm:$0xff] }
 0x89e   :  { %2091 = vrcp.f32 %v1005_v57  ;;  %v2952_v57 = vld [vmem:[#allocation3 + $0x90] sm:$0xff] }
 0x89f   :  { %2093 = vtanh.f32 %v994_v47  ;;  %v1123_v0 = vcombine.high %v1122_v61, %v1122_v61  ;;  %v2907_v47 = vld [vmem:[#allocation3 + $0xb8] sm:$0xff]  ;;  %v2970_v61 = vld [vmem:[#allocation3 + $0x80] sm:$0xff] }
 0x8a0   :  { %2095 = vrcp.f32 %v1004_v59  ;;  %v2961_v59 = vld [vmem:[#allocation3 + $0x88] sm:$0xff] }
 0x8aa   :  { %v2090_v62 = vpop.eup %2089 }
 0x8ab   :  { %v1133_v63 = vrot.slane %v2090_v62, %v3263_v2  ;;  %v2092_v19 = vpop.eup %2091  ;;  %v2976_v62 = vld [vmem:[%s3202_s1 + $0x8] sm:$0xff] }
 0x8ac   :  { %v2094_v41 = vpop.eup %2093 }
 0x8ad   :  { %v1134_v18 = vcombine.high %v1133_v63, %v1133_v63  ;;  %v1011_v38 = vsel %vm105_vm0, %v2094_v41, %v2092_v19  ;;  %v2096_v13 = vpop.eup %2095  ;;  %v1139_v32 = vmul.f32 %v1133_v63, %v2760_v24  ;;  %v2992_v19 = vld [vmem:[#allocation3 + $0x68] sm:$0xff]  ;;  %v2999_v41 = vld [vmem:[#allocation3 + $0xf8] sm:$0xff] }
 0x8ae   :  { %v1013_v34 = vmul.f32 %v2096_v13, %v1011_v38  ;;  %v1012_v21 = vmul.f32 %v2096_v13, %v2765_v37  ;;  %v2859_v37 = vld [vmem:[%s3202_s1 + $0x70] sm:$0xff] }
 0x8af   :  { %v1138_v20 = vsel %vm105_vm0, %v1123_v0, %v1134_v18  ;;  %v2985_v0 = vld [vmem:[%s3202_s1] sm:$0xff]  ;;  %v2988_v18 = vld [vmem:[#allocation3 + $0x70] sm:$0xff]  ;;  %v3008_v13 = vld [vmem:[#allocation3 + $0x48] sm:$0xff] }
 0x8b0   :  { %v1140_v30 = vmul.f32 %v1138_v20, %v1133_v63  ;;  %v2979_v63 = vld [vmem:[#allocation3 + $0x78] sm:$0xff] }
 0x8b2   :  { %1142 = vrot.lane.b32.xlu1 %v1140_v30, %s2248_s12  ;;  %v3002_v30 = vld [vmem:[#allocation3 + $0x58] sm:$0xff] }
 0x8b6   :  { %1015 = vrot.lane.b32.xlu1 %v1013_v34, %s2248_s12  ;;  %v3011_v34 = vld [vmem:[#allocation3 + $0x40] sm:$0xff] }
 0x924   :  { %v1143_v43 = vpop.permute.xlu1 %1142 }
 0x925   :  { %v2840_v31 = vadd.f32 %v1143_v43, %v1139_v32  ;;  %v3014_v32 = vld [vmem:[#allocation3 + $0x38] sm:$0xff] }
 0x927   :  { %2097 = vtanh.f32 %v2840_v31 }
 0x928   :  { %v1016_v16 = vpop.permute.xlu1 %1015 }
 0x929   :  { %v2845_v14 = vadd.f32 %v1016_v16, %v1012_v21 }
 0x92b   :  { %2099 = vtanh.f32 %v2845_v14 }
 0x934   :  { %v2098_v28 = vpop.eup %2097 }
 0x935   :  { %v1147_v17 = vmul.f32 %v2098_v28, %v1138_v20  ;;  %v2996_v20 = vld [vmem:[#allocation3 + $0x60] sm:$0xff] }
 0x937   :  { %1149 = vrot.lane.b32.xlu0 %v1147_v17, %s2248_s12 }
 0x938   :  { %v2100_v26 = vpop.eup %2099 }
 0x939   :  { %v1020_v23 = vmul.f32 %v2100_v26, %v1011_v38  ;;  %v3005_v38 = vld [vmem:[#allocation3 + $0x50] sm:$0xff] }
 0x9a9   :  { %v1150_v25 = vpop.permute.xlu0 %1149 }
 0x9aa   :  { %v1152_v24 = vsel %vm109_vm1, %v1150_v25, %v1020_v23  ;;  %1991 = vmatmul.mubr.msk.f32.vlgmr.msra.gmra.mxu0 %vm109_vm1, %v1150_v25 }
 0x9ab   :  { %1218 = vmatmul.mubr.f32.vlgmr.msra.gmra.mxu1 %v1152_v24  ;;  %1382 = vmatpush1.msra.mxu0 %v2850_v39 }
 0x9ac   :  { %1383 = vmatprep.subr.mxu0 %v2853_v36  ;;  %1498 = vmatpush1.msra.mxu1 %v2859_v37 }
 0x9ad   :  { %1384 = vmatpush1.msra.mxu0 %v2862_v27  ;;  %1499 = vmatprep.subr.mxu1 %v2868_v29 }
 0x9ae   :  { %1385 = vmatprep.subr.mxu0 %v2871_v40  ;;  %1500 = vmatpush1.msra.mxu1 %v2877_v1 }
 0x9af   :  { %1386 = vmatpush1.msra.mxu0 %v2880_v10  ;;  %1501 = vmatprep.subr.mxu1 %v2886_v11 }
 0x9b0   :  { %1387 = vmatprep.subr.mxu0 %v2889_v12  ;;  %1502 = vmatpush1.msra.mxu1 %v2895_v44 }
 0x9b1   :  { %1388 = vmatpush1.msra.mxu0 %v2898_v45  ;;  %1503 = vmatprep.subr.mxu1 %v2904_v46 }
 0x9b2   :  { %1389 = vmatprep.subr.mxu0 %v2907_v47  ;;  %1504 = vmatpush1.msra.mxu1 %v2913_v48 }
 0x9b3   :  { %1390 = vmatpush1.msra.mxu0 %v2916_v49  ;;  %1505 = vmatprep.subr.mxu1 %v2922_v50 }
 0x9b4   :  { %1391 = vmatprep.subr.mxu0 %v2925_v51  ;;  %1506 = vmatpush1.msra.mxu1 %v2931_v52 }
 0x9b5   :  { %1392 = vmatpush1.msra.mxu0 %v2934_v53  ;;  %1507 = vmatprep.subr.mxu1 %v2940_v54 }
 0x9b6   :  { %1393 = vmatprep.subr.mxu0 %v2943_v55  ;;  %1508 = vmatpush1.msra.mxu1 %v2949_v56 }
 0x9b7   :  { %1394 = vmatpush1.msra.mxu0 %v2952_v57  ;;  %1509 = vmatprep.subr.mxu1 %v2958_v58 }
 0x9b8   :  { %1395 = vmatprep.subr.mxu0 %v2961_v59  ;;  %1510 = vmatpush1.msra.mxu1 %v2967_v60 }
 0x9b9   :  { %1396 = vmatpush1.msra.mxu0 %v2970_v61  ;;  %1511 = vmatprep.subr.mxu1 %v2976_v62 }
 0x9ba   :  { %1397 = vmatprep.subr.mxu0 %v2979_v63  ;;  %1512 = vmatpush1.msra.mxu1 %v2985_v0 }
 0x9bb   :  { %1398 = vmatpush1.msra.mxu0 %v2988_v18  ;;  %1545 = vmatprep.mubr.f32.mxu1 %v3250_v15 }
 0x9bc   :  { %1399 = vmatprep.subr.mxu0 %v2992_v19  ;;  %1445 = vmatprep.mubr.f32.mxu0 %v3250_v15 }
 0x9bd   :  { %1400 = vmatpush1.msra.mxu0 %v2996_v20  ;;  %1609 = vmatprep.subr.mxu1 %v2999_v41 }
 0x9be   :  { %1401 = vmatprep.subr.mxu0 %v3002_v30 }
 0x9bf   :  { %1402 = vmatpush1.msra.mxu0 %v3005_v38 }
 0x9c0   :  { %1403 = vmatprep.subr.mxu0 %v3008_v13 }
 0x9c1   :  { %1404 = vmatpush1.msra.mxu0 %v3011_v34 }
 0x9c2   :  { %1405 = vmatprep.subr.mxu0 %v3014_v32 }
 0x9c3   :  { %1406 = vmatpush1.msra.mxu0 %v2505_v22  ;;  %v1990_v22 = vld [vmem:[%s3201_s0 + $0x14] sm:$0xf] }
 0x9c4   :  { %1407 = vmatprep.subr.mxu0 %v3264_v3 }
 0x9c5   :  { %1408 = vmatpush1.msra.mxu0 %v3265_v4 }
 0x9c6   :  { %1409 = vmatprep.subr.mxu0 %v3266_v5 }
 0x9c7   :  { %1410 = vmatpush1.msra.mxu0 %v3267_v6 }
 0x9c8   :  { %1411 = vmatprep.subr.mxu0 %v3268_v7 }
 0x9c9   :  { %1412 = vmatpush1.msra.mxu0 %v3269_v8 }
 0x9ca   :  { %1725 = vmatprep.subr.mxu0 %v2822_v9 }
 0xa6a   :  { %v1319_v43 = vpop.f32.mrf.mxu0 }
 0xa6b   :  { %v1219_v28 = vpop.f32.mrf.mxu1 }
 0xa6c   :  { %v1321_v17 = vpop.f32.mrf.mxu0  ;;  %v1220_v7 = vadd.f32 %v1219_v28, %v2604_v33 }
 0xa6d   :  { %v1326_v16 = vcombine.low %v1319_v43, %v1321_v17  ;;  %v1221_v21 = vpop.f32.mrf.mxu1 }
 0xa6e   :  { %v1222_v3 = vadd.f32 %v1221_v21, %v2600_v42  ;;  %v1988_v9 = vmul.f32 -1.442695, %v1220_v7 }
 0xa6f   :  { %v1333_v4 = vrot.slane %v1326_v16, %v3263_v2 }
 0xa70   :  { %v1989_v5 = vmul.f32 -1.442695, %v1222_v3 }
 0xa71   :  { %v1335_v6 = vadd.f32 %v1990_v22, %v1333_v4 }
 0xa72   :  { %2101 = vpow2.f32 %v1989_v5 }
 0xa73   :  { %v1992_v8 = vmul.f32 -1.442695, %v1335_v6 }
 0xa75   :  { %2103 = vpow2.f32 %v1992_v8 }
 0xa76   :  { %2105 = vpow2.f32 %v1988_v9 }
 0xa77   :  { %2107 = vtanh.f32 %v1335_v6 }
 0xa7f   :  { %v2102_v26 = vpop.eup %2101 }
 0xa80   :  { %v1233_v24 = vadd.f32 1.0, %v2102_v26 }
 0xa82   :  { %v2104_v23 = vpop.eup %2103 }
 0xa83   :  { %v1340_v25 = vadd.f32 1.0, %v2104_v23  ;;  %v2106_v43 = vpop.eup %2105 }
 0xa84   :  { %v1232_v17 = vadd.f32 1.0, %v2106_v43  ;;  %v2108_v16 = vpop.eup %2107 }
 0xa85   :  { %2109 = vrcp.f32 %v1340_v25  ;;  %v1350_v21 = vrot.slane %v2108_v16, %v3263_v2 }
 0xa86   :  { %2111 = vrcp.f32 %v1233_v24 }
 0xa87   :  { %2113 = vtanh.f32 %v1222_v3  ;;  %v1351_v4 = vcombine.high %v1350_v21, %v1350_v21 }
 0xa88   :  { %2115 = vrcp.f32 %v1232_v17 }
 0xa92   :  { %v2110_v28 = vpop.eup %2109 }
 0xa93   :  { %v1361_v22 = vrot.slane %v2110_v28, %v3263_v2  ;;  %v2112_v7 = vpop.eup %2111 }
 0xa94   :  { %v2114_v8 = vpop.eup %2113 }
 0xa95   :  { %v1362_v5 = vcombine.high %v1361_v22, %v1361_v22  ;;  %v1239_v26 = vsel %vm105_vm0, %v2114_v8, %v2112_v7  ;;  %v2116_v3 = vpop.eup %2115  ;;  %v1367_v25 = vmul.f32 %v1361_v22, %v2840_v31 }
 0xa96   :  { %v1241_v23 = vmul.f32 %v2116_v3, %v1239_v26  ;;  %v1240_v28 = vmul.f32 %v2116_v3, %v2845_v14  ;;  %v3092_v14 = vld [vmem:[#allocation3 + $0x30] sm:$0xff] }
 0xa97   :  { %v1366_v6 = vsel %vm105_vm0, %v1351_v4, %v1362_v5 }
 0xa98   :  { %v1368_v9 = vmul.f32 %v1366_v6, %v1361_v22 }
 0xa9a   :  { %1370 = vrot.lane.b32.xlu0 %v1368_v9, %s2248_s12 }
 0xa9e   :  { %1243 = vrot.lane.b32.xlu0 %v1241_v23, %s2248_s12 }
 0xb0c   :  { %v1371_v24 = vpop.permute.xlu0 %1370 }
 0xb0d   :  { %v3040_v43 = vadd.f32 %v1371_v24, %v1367_v25 }
 0xb0f   :  { %2117 = vtanh.f32 %v3040_v43 }
 0xb10   :  { %v1244_v21 = vpop.permute.xlu0 %1243 }
 0xb11   :  { %v3045_v4 = vadd.f32 %v1244_v21, %v1240_v28 }
 0xb13   :  { %2119 = vtanh.f32 %v3045_v4 }
 0xb1c   :  { %v2118_v17 = vpop.eup %2117 }
 0xb1d   :  { %v1375_v16 = vmul.f32 %v2118_v17, %v1366_v6 }
 0xb1f   :  { %1377 = vrot.lane.b32.xlu1 %v1375_v16, %s2248_s12 }
 0xb20   :  { %v2120_v5 = vpop.eup %2119 }
 0xb21   :  { %v1248_v7 = vmul.f32 %v2120_v5, %v1239_v26 }
 0xb91   :  { %v1378_v8 = vpop.permute.xlu1 %1377 }
 0xb92   :  { %v1380_v31 = vsel %vm109_vm1, %v1378_v8, %v1248_v7  ;;  %1996 = vmatmul.mubr.msk.f32.vlgmr.msra.gmra.mxu1 %vm109_vm1, %v1378_v8 }
 0xb93   :  { %1446 = vmatmul.mubr.f32.vlgmr.msra.gmra.mxu0 %v1380_v31  ;;  %1610 = vmatpush1.msra.mxu1 %v2850_v39 }
 0xb94   :  { %1611 = vmatprep.subr.mxu1 %v2853_v36  ;;  %1726 = vmatpush1.msra.mxu0 %v2859_v37  ;;  %v3095_v37 = vld [vmem:[#allocation3 + $0x28] sm:$0xff] }
 0xb95   :  { %1612 = vmatpush1.msra.mxu1 %v2862_v27  ;;  %1727 = vmatprep.subr.mxu0 %v2868_v29  ;;  %v3098_v29 = vld [vmem:[#allocation3 + $0x20] sm:$0xff] }
 0xb96   :  { %1613 = vmatprep.subr.mxu1 %v2871_v40  ;;  %1728 = vmatpush1.msra.mxu0 %v2877_v1  ;;  %v3101_v1 = vld [vmem:[#allocation3 + $0x18] sm:$0xff] }
 0xb97   :  { %1614 = vmatpush1.msra.mxu1 %v2880_v10  ;;  %1729 = vmatprep.subr.mxu0 %v2886_v11  ;;  %v3104_v11 = vld [vmem:[#allocation3 + $0x10] sm:$0xff] }
 0xb98   :  { %1615 = vmatprep.subr.mxu1 %v2889_v12  ;;  %1730 = vmatpush1.msra.mxu0 %v2895_v44  ;;  %v3107_v44 = vld [vmem:[#allocation3 + $0x8] sm:$0xff] }
 0xb99   :  { %1616 = vmatpush1.msra.mxu1 %v2898_v45  ;;  %1731 = vmatprep.subr.mxu0 %v2904_v46  ;;  %v3110_v46 = vld [vmem:[#allocation3] sm:$0xff] }
 0xb9a   :  { %1617 = vmatprep.subr.mxu1 %v2907_v47  ;;  %1732 = vmatpush1.msra.mxu0 %v2913_v48 }
 0xb9b   :  { %1618 = vmatpush1.msra.mxu1 %v2916_v49  ;;  %1733 = vmatprep.subr.mxu0 %v2922_v50 }
 0xb9c   :  { %1619 = vmatprep.subr.mxu1 %v2925_v51  ;;  %1734 = vmatpush1.msra.mxu0 %v2931_v52 }
 0xb9d   :  { %1620 = vmatpush1.msra.mxu1 %v2934_v53  ;;  %1735 = vmatprep.subr.mxu0 %v2940_v54 }
 0xb9e   :  { %1621 = vmatprep.subr.mxu1 %v2943_v55  ;;  %1736 = vmatpush1.msra.mxu0 %v2949_v56 }
 0xb9f   :  { %1622 = vmatpush1.msra.mxu1 %v2952_v57  ;;  %1737 = vmatprep.subr.mxu0 %v2958_v58  ;;  %v1995_v58 = vld [vmem:[%s3201_s0 + $0x18] sm:$0xf] }
 0xba0   :  { %1623 = vmatprep.subr.mxu1 %v2961_v59  ;;  %1738 = vmatpush1.msra.mxu0 %v2967_v60 }
 0xba1   :  { %1624 = vmatpush1.msra.mxu1 %v2970_v61  ;;  %1739 = vmatprep.subr.mxu0 %v2976_v62 }
 0xba2   :  { %1625 = vmatprep.subr.mxu1 %v2979_v63  ;;  %1740 = vmatpush1.msra.mxu0 %v2985_v0 }
 0xba3   :  { %1626 = vmatpush1.msra.mxu1 %v2988_v18  ;;  %1773 = vmatprep.mubr.f32.mxu0 %v3250_v15 }
 0xba4   :  { %1627 = vmatprep.subr.mxu1 %v2992_v19  ;;  %1673 = vmatprep.mubr.f32.mxu1 %v3250_v15 }
 0xba5   :  { %1628 = vmatpush1.msra.mxu1 %v2996_v20  ;;  %1837 = vmatprep.subr.mxu0 %v2999_v41 }
 0xba6   :  { %1629 = vmatprep.subr.mxu1 %v3002_v30 }
 0xba7   :  { %1630 = vmatpush1.msra.mxu1 %v3005_v38 }
 0xba8   :  { %1631 = vmatprep.subr.mxu1 %v3008_v13 }
 0xba9   :  { %1632 = vmatpush1.msra.mxu1 %v3011_v34 }
 0xbaa   :  { %1633 = vmatprep.subr.mxu1 %v3014_v32 }
 0xbab   :  { %1634 = vmatpush1.msra.mxu1 %v3092_v14 }
 0xbac   :  { %1635 = vmatprep.subr.mxu1 %v3095_v37 }
 0xbad   :  { %1636 = vmatpush1.msra.mxu1 %v3098_v29 }
 0xbae   :  { %1637 = vmatprep.subr.mxu1 %v3101_v1 }
 0xbaf   :  { %1638 = vmatpush1.msra.mxu1 %v3104_v11 }
 0xbb0   :  { %1639 = vmatprep.subr.mxu1 %v3107_v44 }
 0xbb1   :  { %1640 = vmatpush1.msra.mxu1 %v3110_v46 }
 0xc52   :  { %v1547_v48 = vpop.f32.mrf.mxu1 }
 0xc53   :  { %v1447_v50 = vpop.f32.mrf.mxu0 }
 0xc54   :  { %v1549_v52 = vpop.f32.mrf.mxu1  ;;  %v1448_v22 = vadd.f32 %v1447_v50, %v2604_v33 }
 0xc55   :  { %v1554_v54 = vcombine.low %v1547_v48, %v1549_v52  ;;  %v1449_v56 = vpop.f32.mrf.mxu0 }
 0xc56   :  { %v1450_v60 = vadd.f32 %v1449_v56, %v2600_v42  ;;  %v1993_v9 = vmul.f32 -1.442695, %v1448_v22 }
 0xc57   :  { %v1561_v62 = vrot.slane %v1554_v54, %v3263_v2 }
 0xc58   :  { %v1994_v0 = vmul.f32 -1.442695, %v1450_v60 }
 0xc59   :  { %v1563_v41 = vadd.f32 %v1995_v58, %v1561_v62 }
 0xc5a   :  { %2121 = vpow2.f32 %v1994_v0 }
 0xc5b   :  { %v1997_v6 = vmul.f32 -1.442695, %v1563_v41 }
 0xc5d   :  { %2123 = vpow2.f32 %v1997_v6 }
 0xc5e   :  { %2125 = vpow2.f32 %v1993_v9 }
 0xc5f   :  { %2127 = vtanh.f32 %v1563_v41 }
 0xc67   :  { %v2122_v26 = vpop.eup %2121 }
 0xc68   :  { %v1461_v25 = vadd.f32 1.0, %v2122_v26 }
 0xc6a   :  { %v2124_v3 = vpop.eup %2123 }
 0xc6b   :  { %v1568_v23 = vadd.f32 1.0, %v2124_v3  ;;  %v2126_v24 = vpop.eup %2125 }
 0xc6c   :  { %v1460_v17 = vadd.f32 1.0, %v2126_v24  ;;  %v2128_v16 = vpop.eup %2127 }
 0xc6d   :  { %2129 = vrcp.f32 %v1568_v23  ;;  %v1578_v21 = vrot.slane %v2128_v16, %v3263_v2 }
 0xc6e   :  { %2131 = vrcp.f32 %v1461_v25 }
 0xc6f   :  { %2133 = vtanh.f32 %v1450_v60  ;;  %v1579_v7 = vcombine.high %v1578_v21, %v1578_v21 }
 0xc70   :  { %2135 = vrcp.f32 %v1460_v17 }
 0xc7a   :  { %v2130_v28 = vpop.eup %2129 }
 0xc7b   :  { %v1589_v5 = vrot.slane %v2130_v28, %v3263_v2  ;;  %v2132_v31 = vpop.eup %2131 }
 0xc7c   :  { %v2134_v50 = vpop.eup %2133 }
 0xc7d   :  { %v1590_v8 = vcombine.high %v1589_v5, %v1589_v5  ;;  %v1467_v54 = vsel %vm105_vm0, %v2134_v50, %v2132_v31  ;;  %v2136_v56 = vpop.eup %2135  ;;  %v1595_v60 = vmul.f32 %v1589_v5, %v3040_v43  ;;  %v2005_v50 = vld [vmem:[%s3205_s4] ss:$0 sm:$0xff] }
 0xc7e   :  { %v1469_v58 = vmul.f32 %v2136_v56, %v1467_v54  ;;  %v1468_v9 = vmul.f32 %v2136_v56, %v3045_v4 }
 0xc7f   :  { %v1594_v48 = vsel %vm105_vm0, %v1579_v7, %v1590_v8 }
 0xc80   :  { %v1596_v52 = vmul.f32 %v1594_v48, %v1589_v5 }
 0xc82   :  { %1598 = vrot.lane.b32.xlu1 %v1596_v52, %s2248_s12 }
 0xc86   :  { %1471 = vrot.lane.b32.xlu1 %v1469_v58, %s2248_s12 }
 0xcf4   :  { %v1599_v62 = vpop.permute.xlu1 %1598 }
 0xcf5   :  { %v3128_v0 = vadd.f32 %v1599_v62, %v1595_v60 }
 0xcf7   :  { %2137 = vtanh.f32 %v3128_v0 }
 0xcf8   :  { %v1472_v6 = vpop.permute.xlu1 %1471 }
 0xcf9   :  { %v3133_v26 = vadd.f32 %v1472_v6, %v1468_v9 }
 0xcfb   :  { %2139 = vtanh.f32 %v3133_v26 }
 0xd04   :  { %v2138_v41 = vpop.eup %2137 }
 0xd05   :  { %v1603_v22 = vmul.f32 %v2138_v41, %v1594_v48 }
 0xd07   :  { %1605 = vrot.lane.b32.xlu0 %v1603_v22, %s2248_s12 }
 0xd08   :  { %v2140_v3 = vpop.eup %2139 }
 0xd09   :  { %v1476_v23 = vmul.f32 %v2140_v3, %v1467_v54 }
 0xd79   :  { %v1606_v25 = vpop.permute.xlu0 %1605 }
 0xd7a   :  { %v1608_v43 = vsel %vm109_vm1, %v1606_v25, %v1476_v23  ;;  %2001 = vmatmul.mubr.msk.f32.vlgmr.msra.gmra.mxu0 %vm109_vm1, %v1606_v25 }
 0xd7b   :  { %1674 = vmatmul.mubr.f32.vlgmr.msra.gmra.mxu1 %v1608_v43  ;;  %1838 = vmatpush1.msra.mxu0 %v2850_v39 }
 0xd7c   :  { %1839 = vmatprep.subr.mxu0 %v2853_v36  ;;  %1901 = vmatprep.mubr.f32.mxu0 %v3250_v15 }
 0xd7d   :  { %1840 = vmatpush1.msra.mxu0 %v2862_v27 }
 0xd7e   :  { %1841 = vmatprep.subr.mxu0 %v2871_v40 }
 0xd7f   :  { %1842 = vmatpush1.msra.mxu0 %v2880_v10 }
 0xd80   :  { %1843 = vmatprep.subr.mxu0 %v2889_v12 }
 0xd81   :  { %1844 = vmatpush1.msra.mxu0 %v2898_v45  ;;  %v2000_v45 = vld [vmem:[%s3201_s0 + $0x1c] sm:$0xf] }
 0xd82   :  { %1845 = vmatprep.subr.mxu0 %v2907_v47 }
 0xd83   :  { %1846 = vmatpush1.msra.mxu0 %v2916_v49 }
 0xd84   :  { %1847 = vmatprep.subr.mxu0 %v2925_v51 }
 0xd85   :  { %1848 = vmatpush1.msra.mxu0 %v2934_v53 }
 0xd86   :  { %1849 = vmatprep.subr.mxu0 %v2943_v55 }
 0xd87   :  { %1850 = vmatpush1.msra.mxu0 %v2952_v57 }
 0xd88   :  { %1851 = vmatprep.subr.mxu0 %v2961_v59 }
 0xd89   :  { %1852 = vmatpush1.msra.mxu0 %v2970_v61 }
 0xd8a   :  { %1853 = vmatprep.subr.mxu0 %v2979_v63 }
 0xd8b   :  { %1854 = vmatpush1.msra.mxu0 %v2988_v18 }
 0xd8c   :  { %1855 = vmatprep.subr.mxu0 %v2992_v19 }
 0xd8d   :  { %1856 = vmatpush1.msra.mxu0 %v2996_v20 }
 0xd8e   :  { %1857 = vmatprep.subr.mxu0 %v3002_v30 }
 0xd8f   :  { %1858 = vmatpush1.msra.mxu0 %v3005_v38 }
 0xd90   :  { %1859 = vmatprep.subr.mxu0 %v3008_v13 }
 0xd91   :  { %1860 = vmatpush1.msra.mxu0 %v3011_v34 }
 0xd92   :  { %1861 = vmatprep.subr.mxu0 %v3014_v32 }
 0xd93   :  { %1862 = vmatpush1.msra.mxu0 %v3092_v14 }
 0xd94   :  { %1863 = vmatprep.subr.mxu0 %v3095_v37 }
 0xd95   :  { %1864 = vmatpush1.msra.mxu0 %v3098_v29 }
 0xd96   :  { %1865 = vmatprep.subr.mxu0 %v3101_v1 }
 0xd97   :  { %1866 = vmatpush1.msra.mxu0 %v3104_v11 }
 0xd98   :  { %1867 = vmatprep.subr.mxu0 %v3107_v44 }
 0xd99   :  { %1868 = vmatpush1.msra.mxu0 %v3110_v46 }
 0xe3a   :  { %v1775_v15 = vpop.f32.mrf.mxu0 }
 0xe3b   :  { %v1675_v39 = vpop.f32.mrf.mxu1 }
 0xe3c   :  { %v1676_v36 = vadd.f32 %v1675_v39, %v2604_v33  ;;  %v1777_v27 = vpop.f32.mrf.mxu0 }
 0xe3d   :  { %v1782_v40 = vcombine.low %v1775_v15, %v1777_v27  ;;  %v1677_v10 = vpop.f32.mrf.mxu1 }
 0xe3e   :  { %v1998_v12 = vmul.f32 -1.442695, %v1676_v36  ;;  %v1678_v47 = vadd.f32 %v1677_v10, %v2600_v42 }
 0xe3f   :  { %v1789_v49 = vrot.slane %v1782_v40, %v3263_v2 }
 0xe40   :  { %2141 = vpow2.f32 %v1998_v12  ;;  %v1999_v51 = vmul.f32 -1.442695, %v1678_v47  ;;  %v2006_v12 = vld [vmem:[#allocation2] ss:$0 sm:$0xff] }
 0xe41   :  { %v1791_v53 = vadd.f32 %v2000_v45, %v1789_v49 }
 0xe42   :  { %2143 = vpow2.f32 %v1999_v51 }
 0xe43   :  { %v2002_v55 = vmul.f32 -1.442695, %v1791_v53 }
 0xe45   :  { %2145 = vpow2.f32 %v2002_v55 }
 0xe46   :  { %2147 = vtanh.f32 %v1678_v47 }
 0xe47   :  { %2149 = vtanh.f32 %v1791_v53 }
 0xe4d   :  { %v2142_v57 = vpop.eup %2141 }
 0xe4e   :  { %v1688_v61 = vadd.f32 1.0, %v2142_v57 }
 0xe4f   :  { %v2144_v59 = vpop.eup %2143 }
 0xe50   :  { %v1689_v63 = vadd.f32 1.0, %v2144_v59 }
 0xe52   :  { %v2146_v18 = vpop.eup %2145  ;;  %2151 = vrcp.f32 %v1689_v63 }
 0xe53   :  { %2153 = vrcp.f32 %v1688_v61  ;;  %v1796_v19 = vadd.f32 1.0, %v2146_v18  ;;  %v2148_v20 = vpop.eup %2147 }
 0xe54   :  { %v2150_v30 = vpop.eup %2149 }
 0xe55   :  { %2155 = vrcp.f32 %v1796_v19  ;;  %v1806_v4 = vrot.slane %v2150_v30, %v3263_v2 }
 0xe57   :  { %v1807_v29 = vcombine.high %v1806_v4, %v1806_v4 }
 0xe5f   :  { %v2152_v38 = vpop.eup %2151 }
 0xe60   :  { %v2154_v13 = vpop.eup %2153  ;;  %v1695_v34 = vsel %vm105_vm0, %v2148_v20, %v2152_v38 }
 0xe61   :  { %v1697_v32 = vmul.f32 %v2154_v13, %v1695_v34 }
 0xe62   :  { %v2156_v14 = vpop.eup %2155 }
 0xe63   :  { %1699 = vrot.lane.b32.xlu1 %v1697_v32, %s2248_s12  ;;  %v1817_v37 = vrot.slane %v2156_v14, %v3263_v2  ;;  %v1696_v2 = vmul.f32 %v2154_v13, %v3133_v26 }
 0xe65   :  { %v1818_v1 = vcombine.high %v1817_v37, %v1817_v37  ;;  %v1823_v46 = vmul.f32 %v1817_v37, %v3128_v0 }
 0xe67   :  { %v1822_v11 = vsel %vm105_vm0, %v1807_v29, %v1818_v1 }
 0xe68   :  { %v1824_v44 = vmul.f32 %v1822_v11, %v1817_v37 }
 0xe6a   :  { %1826 = vrot.lane.b32.xlu0 %v1824_v44, %s2248_s12 }
 0xed5   :  { %v1700_v28 = vpop.permute.xlu1 %1699 }
 0xed6   :  { %v1702_v5 = vadd.f32 %v1700_v28, %v1696_v2 }
 0xedc   :  { %v1827_v24 = vpop.permute.xlu0 %1826 }
 0xedd   :  { %v1829_v17 = vadd.f32 %v1827_v24, %v1823_v46 }
 0xedf   :  { %2157 = vtanh.f32 %v1829_v17 }
 0xee0   :  { %2159 = vtanh.f32 %v1702_v5 }
 0xeec   :  { %v2158_v16 = vpop.eup %2157 }
 0xeed   :  { %v1831_v21 = vmul.f32 %v2158_v16, %v1822_v11  ;;  %v2160_v7 = vpop.eup %2159 }
 0xeee   :  { %v1704_v8 = vmul.f32 %v2160_v7, %v1695_v34 }
 0xeef   :  { %1833 = vrot.lane.b32.xlu0 %v1831_v21, %s2248_s12 }
 0xef3   :  { %1939 = vrot.lane.b32.xlu0 %v2005_v50, %s2248_s12 }
 0xf61   :  { %v1834_v31 = vpop.permute.xlu0 %1833 }
 0xf62   :  { %v1836_v48 = vsel %vm109_vm1, %v1834_v31, %v1704_v8 }
 0xf63   :  { %1902 = vmatmul.mubr.f32.vlgmr.msra.gmra.mxu0 %v1836_v48 }
 0xf65   :  { %v1940_v39 = vpop.permute.xlu0 %1939 }
0x1023   :  { %v1903_v52 = vpop.f32.mrf.mxu0 }
0x1024   :  { %v1904_v54 = vadd.f32 %v1903_v52, %v2604_v33 }
0x1025   :  { %v1905_v56 = vpop.f32.mrf.mxu0 }
0x1026   :  { %v2003_v58 = vmul.f32 -1.442695, %v1904_v54  ;;  %v1906_v60 = vadd.f32 %v1905_v56, %v2600_v42 }
0x1028   :  { %2161 = vpow2.f32 %v2003_v58  ;;  %v2004_v62 = vmul.f32 -1.442695, %v1906_v60 }
0x102a   :  { %2163 = vpow2.f32 %v2004_v62 }
0x102b   :  { %2165 = vtanh.f32 %v1906_v60 }
0x1035   :  { %v2162_v0 = vpop.eup %2161 }
0x1036   :  { %v1916_v22 = vadd.f32 1.0, %v2162_v0 }
0x1037   :  { %v2164_v41 = vpop.eup %2163 }
0x1038   :  { %v1917_v6 = vadd.f32 1.0, %v2164_v41  ;;  %v2166_v9 = vpop.eup %2165 }
0x103a   :  { %2167 = vrcp.f32 %v1917_v6 }
0x103b   :  { %2169 = vrcp.f32 %v1916_v22 }
0x1047   :  { %v2168_v26 = vpop.eup %2167 }
0x1048   :  { %v2170_v3 = vpop.eup %2169  ;;  %v1923_v33 = vsel %vm105_vm0, %v2166_v9, %v2168_v26 }
0x1049   :  { %v1925_v23 = vmul.f32 %v2170_v3, %v1923_v33  ;;  %v1924_v42 = vmul.f32 %v2170_v3, %v1702_v5 }
0x104b   :  { %1927 = vrot.lane.b32.xlu1 %v1925_v23, %s2248_s12 }
0x10bd   :  { %v1928_v25 = vpop.permute.xlu1 %1927 }
0x10be   :  { %v1930_v43 = vadd.f32 %v1928_v25, %v1924_v42 }
0x10c0   :  { %2171 = vtanh.f32 %v1930_v43 }
0x10cd   :  { %v2172_v15 = vpop.eup %2171 }
0x10ce   :  { %v1932_v36 = vmul.f32 %v2172_v15, %v1923_v33 }
0x10d0   :  { %v1942_v27 = vmul.f32 %v1940_v39, %v1932_v36 }
0x10d2   :  { %1944 = vrot.lane.b32.xlu1 %v1942_v27, %s2248_s12 }
0x1144   :  { %v1945_v40 = vpop.permute.xlu1 %1944 }
0x1145   :  { %v1948_v10 = vsel %vm1947_vm2, %v1945_v40, 0.0 }
0x1146   :  { %1949 = vadd.xlane.f32.xlu0 %v1948_v10 }
0x11cf   :  { %v1950_v35 = vpop.xlane.xlu0 %1949 }
0x11d0   :  { %v1958_v45 = vadd.f32 %v2006_v12, %v1950_v35 }
0x11d2   :  { %1960 = vst.msk [vmem:[%s3207_s6] sm:$0x3] %vm1959_vm3, %v1958_v45 }
0x11d3   :  { %1965 = vsyncpa [#allocation4], 1 }

</bundles_post_ra>
